<compile_context>
chip_gen: v7x
topology: tpu7x:2x2x1
jax: 0.10.0
libtpu: 0.0.40
codegen_flags: <defaults>
</compile_context>

<pallas_src>
import functools

import jax
import jax.numpy as jnp
from jax import lax
from jax.experimental import pallas as pl
from jax.experimental.pallas import tpu as pltpu

EPS = 1e-5


# ---------------------------------------------------------------------------
# Fused kernel, one batch element per grid step.
#   x_ref  : (1, H, 2, W/2, C)   input with W-parity pre-split (b=0 even cols)
#   w1_ref : (C, 2C)   BN1 scale folded          b1_ref: (1, 2C)
#   w2_ref : (2C, C)   BN2 scale folded          b2_ref: (1, C)
#   w3_ref : (9, C, 2C) BN3 scale folded taps    b3_ref: (1, 2C)
#   o_ref  : (1, Ho, Wo, 2C)
#   acc_ref: (Ho*Wo, 2C) f32 scratch accumulator
#   pee/peo/poe: padded stride-2 phase scratches of z
# ---------------------------------------------------------------------------
def _resblock_kernel(x_ref, w1_ref, b1_ref, w2_ref, b2_ref, w3_ref, b3_ref,
                     o_ref, acc_ref, pee_ref, peo_ref, poe_ref,
                     *, H, Wo, C, C2):
    Ho = H // 2

    # ---- pointwise path: z = x + relu(relu(x@w1f + b1) @ w2f + b2) --------
    x2 = x_ref[0].reshape(H * 2 * Wo, C)                        # (H*W, C)
    h = jnp.dot(x2, w1_ref[...], preferred_element_type=jnp.float32)
    h = jnp.maximum(h + b1_ref[...], 0.0)
    h = jnp.dot(h, w2_ref[...], preferred_element_type=jnp.float32)
    h = jnp.maximum(h + b2_ref[...], 0.0)
    z2 = x2 + h                                                 # (H*W, C)

    # ---- split z into its 4 stride-2 phases (leading-dim reshapes only) ---
    z4 = z2.reshape(H, 2, Wo, C)                 # (row, col-parity, W/2, C)
    z_we = z4[:, 0, :, :].reshape(Ho, 2, Wo, C)  # even cols, split row parity
    z_wo = z4[:, 1, :, :].reshape(Ho, 2, Wo, C)  # odd  cols
    z_ee = z_we[:, 0]        # even rows, even cols   (Ho, Wo, C)
    z_oe = z_we[:, 1]        # odd  rows, even cols
    z_eo = z_wo[:, 0]        # even rows, odd  cols
    z_oo = z_wo[:, 1]        # odd  rows, odd  cols

    # ---- padded phases of z (pad=1 on top/left; bottom/right never read) --
    # padded-even rows/cols = [zero pad ; odd unpadded rows/cols]
    # padded-odd  rows/cols = even unpadded rows/cols
    pee_ref[...] = jnp.zeros_like(pee_ref)       # (Ho+1, Wo+1, C)
    peo_ref[...] = jnp.zeros_like(peo_ref)       # (Ho+1, Wo,   C)
    poe_ref[...] = jnp.zeros_like(poe_ref)       # (Ho,   Wo+1, C)
    pee_ref[1:, 1:, :] = z_oo
    peo_ref[1:, :, :] = z_oe
    poe_ref[:, 1:, :] = z_eo
    # padded-odd/odd phase is z_ee itself (no padding involved)

    # ---- 3x3 stride-2 conv as 9 accumulating matmuls ----------------------
    acc_ref[...] = jnp.zeros_like(acc_ref)
    phase_ref = {(0, 0): pee_ref, (0, 1): peo_ref, (1, 0): poe_ref}
    for kh in range(3):
        for kw in range(3):
            hp, wp = kh % 2, kw % 2
            oh, ow = kh // 2, kw // 2
            if (hp, wp) == (1, 1):
                patch = z_ee                                    # (Ho, Wo, C)
            else:
                src = phase_ref[(hp, wp)]
                patch = src[oh:oh + Ho, ow:ow + Wo, :]          # (Ho, Wo, C)
            acc_ref[...] += jnp.dot(patch.reshape(Ho * Wo, C),
                                    w3_ref[kh * 3 + kw],
                                    preferred_element_type=jnp.float32)

    out = jnp.maximum(acc_ref[...] + b3_ref[...], 0.0)
    o_ref[...] = out.reshape(1, Ho, Wo, C2)


# ---------------------------------------------------------------------------
# Wrapper: layout glue at the NCHW boundary + BN folding + pallas_call.
# ---------------------------------------------------------------------------
def res_block_forward(x_nchw, params):
    N, C, H, W = x_nchw.shape
    assert H % 2 == 0 and W % 2 == 0, "even spatial dims required"
    C2 = 2 * C
    Ho, Wo = H // 2, W // 2

    # NCHW -> (N, H, 2, W/2, C).  One boundary relayout pass (unavoidable for
    # the NCHW interface); the W-parity split rides along for free so the
    # kernel never needs strided slicing.
    x = jnp.transpose(x_nchw, (0, 2, 3, 1)).astype(jnp.float32)
    xr = jnp.transpose(x.reshape(N, H, Wo, 2, C), (0, 1, 3, 2, 4))

    def fold_bn(g, b, m, v):
        s = g * lax.rsqrt(v + EPS)
        return s.astype(jnp.float32), (b - m * s).astype(jnp.float32)

    s1, b1 = fold_bn(params["bn1_g"], params["bn1_b"], params["bn1_m"], params["bn1_v"])
    s2, b2 = fold_bn(params["bn2_g"], params["bn2_b"], params["bn2_m"], params["bn2_v"])
    s3, b3 = fold_bn(params["bn3_g"], params["bn3_b"], params["bn3_m"], params["bn3_v"])

    # Fold BN scales into the conv weights (review: drop per-element scale).
    w1f = params["w1"][:, :, 0, 0].T * s1[None, :]                       # (C, 2C)
    w2f = params["w2"][:, :, 0, 0].T * s2[None, :]                       # (2C, C)
    w3f = (jnp.transpose(params["w3"], (2, 3, 1, 0))                     # (3,3,C,2C)
           * s3[None, None, None, :]).reshape(9, C, C2)
    b1 = b1[None, :]
    b2 = b2[None, :]
    b3 = b3[None, :]

    kernel = functools.partial(_resblock_kernel, H=H, Wo=Wo, C=C, C2=C2)

    flops = (2 * N * H * W * (C * C2 + C2 * C)        # two 1x1 convs
             + 2 * N * Ho * Wo * 9 * C * C2)          # 3x3 stride-2 conv
    bytes_accessed = 4 * (N * H * W * C + N * Ho * Wo * C2
                          + w1f.size + w2f.size + w3f.size
                          + b1.size + b2.size + b3.size)

    const2 = lambda n: (0, 0)
    out = pl.pallas_call(
        kernel,
        out_shape=jax.ShapeDtypeStruct((N, Ho, Wo, C2), jnp.float32),
        grid_spec=pltpu.PrefetchScalarGridSpec(
            num_scalar_prefetch=0,
            grid=(N,),
            in_specs=[
                pl.BlockSpec((1, H, 2, Wo, C), lambda n: (n, 0, 0, 0, 0)),
                pl.BlockSpec((C, C2), const2),
                pl.BlockSpec((1, C2), const2),
                pl.BlockSpec((C2, C), const2),
                pl.BlockSpec((1, C), const2),
                pl.BlockSpec((9, C, C2), lambda n: (0, 0, 0)),
                pl.BlockSpec((1, C2), const2),
            ],
            out_specs=pl.BlockSpec((1, Ho, Wo, C2), lambda n: (n, 0, 0, 0)),
            scratch_shapes=[
                pltpu.VMEM((Ho * Wo, C2), jnp.float32),       # conv accumulator
                pltpu.VMEM((Ho + 1, Wo + 1, C), jnp.float32),  # padded phase ee
                pltpu.VMEM((Ho + 1, Wo, C), jnp.float32),      # padded phase eo
                pltpu.VMEM((Ho, Wo + 1, C), jnp.float32),      # padded phase oe
            ],
        ),
        compiler_params=pltpu.CompilerParams(
            dimension_semantics=("parallel",),
            vmem_limit_bytes=64 * 1024 * 1024,
        ),
        cost_estimate=pl.CostEstimate(flops=flops, transcendentals=0,
                                      bytes_accessed=bytes_accessed),
    )(xr, w1f, b1, w2f, b2, w3f, b3)

    # Back to the PyTorch NCHW interface (one boundary pass).
    return jnp.transpose(out, (0, 3, 1, 2))


# ---------------------------------------------------------------------------
# Pure-JAX reference (mirrors the PyTorch forward, eval-mode BN)
# ---------------------------------------------------------------------------
def ref_forward(x_nchw, params):
    dn = ("NCHW", "OIHW", "NCHW")

    def bn(x, g, b, m, v):
        s = (g * lax.rsqrt(v + EPS))[None, :, None, None]
        return (x - m[None, :, None, None]) * s + b[None, :, None, None]

    h = lax.conv_general_dilated(x_nchw, params["w1"], (1, 1), "VALID",
                                 dimension_numbers=dn)
    h = jax.nn.relu(bn(h, params["bn1_g"], params["bn1_b"], params["bn1_m"], params["bn1_v"]))
    h = lax.conv_general_dilated(h, params["w2"], (1, 1), "VALID",
                                 dimension_numbers=dn)
    y = jax.nn.relu(bn(h, params["bn2_g"], params["bn2_b"], params["bn2_m"], params["bn2_v"]))
    z = x_nchw + y
    h = lax.conv_general_dilated(z, params["w3"], (2, 2), ((1, 1), (1, 1)),
                                 dimension_numbers=dn)
    return jax.nn.relu(bn(h, params["bn3_g"], params["bn3_b"], params["bn3_m"], params["bn3_v"]))


def init_params(key, din):
    d2 = 2 * din
    ks = jax.random.split(key, 6)

    def bn_init(k, c):
        k1, k2, k3, k4 = jax.random.split(k, 4)
        g = jax.random.uniform(k1, (c,), jnp.float32, 0.5, 1.5)
        b = jax.random.normal(k2, (c,), jnp.float32) * 0.1
        m = jax.random.normal(k3, (c,), jnp.float32) * 0.1
        v = jax.random.uniform(k4, (c,), jnp.float32, 0.5, 1.5)
        return g, b, m, v

    w1 = jax.random.normal(ks[0], (d2, din, 1, 1), jnp.float32) / jnp.sqrt(din)
    w2 = jax.random.normal(ks[1], (din, d2, 1, 1), jnp.float32) / jnp.sqrt(d2)
    w3 = jax.random.normal(ks[2], (d2, din, 3, 3), jnp.float32) / jnp.sqrt(9.0 * din)
    bn1 = bn_init(ks[3], d2)
    bn2 = bn_init(ks[4], din)
    bn3 = bn_init(ks[5], d2)
    return {
        "w1": w1, "w2": w2, "w3": w3,
        "bn1_g": bn1[0], "bn1_b": bn1[1], "bn1_m": bn1[2], "bn1_v": bn1[3],
        "bn2_g": bn2[0], "bn2_b": bn2[1], "bn2_m": bn2[2], "bn2_v": bn2[3],
        "bn3_g": bn3[0], "bn3_b": bn3[1], "bn3_m": bn3[2], "bn3_v": bn3[3],
    }


if __name__ == "__main__":
    key = jax.random.PRNGKey(0)
    kx, kp = jax.random.split(key)
    N, C, H, W = 2, 4, 16, 16          # din = 4
    x = jax.random.normal(kx, (N, C, H, W), jnp.float32)
    params = init_params(kp, C)

    fwd = jax.jit(res_block_forward)
    out = jax.block_until_ready(fwd(x, params))
    ref = jax.block_until_ready(ref_forward(x, params))

    assert out.shape == (N, 2 * C, H // 2, W // 2), out.shape
    max_err = float(jnp.max(jnp.abs(out - ref)))
    assert max_err < 1e-3, f"mismatch vs reference: {max_err}"
    print("KERNEL_OK")
</pallas_src>

<mosaic_0001>
module attributes {stable_mosaic.version = 11 : i64} {
  func.func @_resblock_kernel(%arg0: i32, %arg1: memref<1x16x2x8x4xf32, #tpu.memory_space<vmem>>, %arg2: memref<4x8xf32, #tpu.memory_space<vmem>>, %arg3: memref<1x8xf32, #tpu.memory_space<vmem>>, %arg4: memref<8x4xf32, #tpu.memory_space<vmem>>, %arg5: memref<1x4xf32, #tpu.memory_space<vmem>>, %arg6: memref<9x4x8xf32, #tpu.memory_space<vmem>>, %arg7: memref<1x8xf32, #tpu.memory_space<vmem>>, %arg8: memref<1x8x8x8xf32, #tpu.memory_space<vmem>>, %arg9: memref<64x8xf32, #tpu.memory_space<vmem>>, %arg10: memref<9x9x4xf32, #tpu.memory_space<vmem>>, %arg11: memref<9x8x4xf32, #tpu.memory_space<vmem>>, %arg12: memref<8x9x4xf32, #tpu.memory_space<vmem>>) attributes {dimension_semantics = [#tpu.dimension_semantics<parallel>], iteration_bounds = array<i64: 2>, scalar_prefetch = 0 : i64, scratch_operands = 4 : i64, tpu.core_type = #tpu.core_type<tc>, window_params = [{transform_indices = @transform_0, window_bounds = array<i64: 1, 16, 2, 8, 4>}, {pipeline_mode = #tpu.pipeline_mode<synchronous>, transform_indices = @transform_1, window_bounds = array<i64: 4, 8>}, {pipeline_mode = #tpu.pipeline_mode<synchronous>, transform_indices = @transform_2, window_bounds = array<i64: 1, 8>}, {pipeline_mode = #tpu.pipeline_mode<synchronous>, transform_indices = @transform_3, window_bounds = array<i64: 8, 4>}, {pipeline_mode = #tpu.pipeline_mode<synchronous>, transform_indices = @transform_4, window_bounds = array<i64: 1, 4>}, {pipeline_mode = #tpu.pipeline_mode<synchronous>, transform_indices = @transform_5, window_bounds = array<i64: 9, 4, 8>}, {pipeline_mode = #tpu.pipeline_mode<synchronous>, transform_indices = @transform_6, window_bounds = array<i64: 1, 8>}, {transform_indices = @transform_7, window_bounds = array<i64: 1, 8, 8, 8>}]} {
    %c0 = arith.constant 0 : index
    %c0_0 = arith.constant 0 : index
    %c0_1 = arith.constant 0 : index
    %c0_2 = arith.constant 0 : index
    %c0_3 = arith.constant 0 : index
    %0 = vector.load %arg1[%c0, %c0_0, %c0_1, %c0_2, %c0_3] : memref<1x16x2x8x4xf32, #tpu.memory_space<vmem>>, vector<1x16x2x8x4xf32>
    %1 = vector.shape_cast %0 : vector<1x16x2x8x4xf32> to vector<16x2x8x4xf32>
    %2 = vector.shape_cast %1 : vector<16x2x8x4xf32> to vector<256x4xf32>
    %c0_4 = arith.constant 0 : index
    %c0_5 = arith.constant 0 : index
    %3 = vector.load %arg2[%c0_4, %c0_5] : memref<4x8xf32, #tpu.memory_space<vmem>>, vector<4x8xf32>
    %cst = arith.constant dense<0.000000e+00> : vector<256x8xf32>
    %4 = tpu.matmul %2, %3, %cst {dimension_numbers = #tpu.dot_dimension_numbers<[1], [0], [0], [1], [0, 0, 1, 1], [], []>} : vector<256x4xf32>, vector<4x8xf32>, vector<256x8xf32> -> vector<256x8xf32>
    %c0_6 = arith.constant 0 : index
    %c0_7 = arith.constant 0 : index
    %5 = vector.load %arg3[%c0_6, %c0_7] : memref<1x8xf32, #tpu.memory_space<vmem>>, vector<1x8xf32>
    %6 = vector.broadcast %5 : vector<1x8xf32> to vector<256x8xf32>
    %7 = arith.addf %4, %6 : vector<256x8xf32>
    %cst_8 = arith.constant 0.000000e+00 : f32
    %8 = vector.broadcast %cst_8 : f32 to vector<256x8xf32>
    %9 = arith.maximumf %7, %8 : vector<256x8xf32>
    %c0_9 = arith.constant 0 : index
    %c0_10 = arith.constant 0 : index
    %10 = vector.load %arg4[%c0_9, %c0_10] : memref<8x4xf32, #tpu.memory_space<vmem>>, vector<8x4xf32>
    %cst_11 = arith.constant dense<0.000000e+00> : vector<256x4xf32>
    %11 = tpu.matmul %9, %10, %cst_11 {dimension_numbers = #tpu.dot_dimension_numbers<[1], [0], [0], [1], [0, 0, 1, 1], [], []>} : vector<256x8xf32>, vector<8x4xf32>, vector<256x4xf32> -> vector<256x4xf32>
    %c0_12 = arith.constant 0 : index
    %c0_13 = arith.constant 0 : index
    %12 = vector.load %arg5[%c0_12, %c0_13] : memref<1x4xf32, #tpu.memory_space<vmem>>, vector<1x4xf32>
    %13 = vector.broadcast %12 : vector<1x4xf32> to vector<256x4xf32>
    %14 = arith.addf %11, %13 : vector<256x4xf32>
    %cst_14 = arith.constant 0.000000e+00 : f32
    %15 = vector.broadcast %cst_14 : f32 to vector<256x4xf32>
    %16 = arith.maximumf %14, %15 : vector<256x4xf32>
    %17 = arith.addf %2, %16 : vector<256x4xf32>
    %18 = vector.shape_cast %17 : vector<256x4xf32> to vector<16x2x8x4xf32>
    %19 = vector.extract_strided_slice %18 {offsets = [0, 0, 0, 0], sizes = [16, 1, 8, 4], strides = [1, 1, 1, 1]} : vector<16x2x8x4xf32> to vector<16x1x8x4xf32>
    %20 = vector.shape_cast %19 : vector<16x1x8x4xf32> to vector<16x8x4xf32>
    %21 = vector.shape_cast %20 : vector<16x8x4xf32> to vector<8x2x8x4xf32>
    %22 = vector.extract_strided_slice %18 {offsets = [0, 1, 0, 0], sizes = [16, 1, 8, 4], strides = [1, 1, 1, 1]} : vector<16x2x8x4xf32> to vector<16x1x8x4xf32>
    %23 = vector.shape_cast %22 : vector<16x1x8x4xf32> to vector<16x8x4xf32>
    %24 = vector.shape_cast %23 : vector<16x8x4xf32> to vector<8x2x8x4xf32>
    %25 = vector.extract_strided_slice %21 {offsets = [0, 0, 0, 0], sizes = [8, 1, 8, 4], strides = [1, 1, 1, 1]} : vector<8x2x8x4xf32> to vector<8x1x8x4xf32>
    %26 = vector.shape_cast %25 : vector<8x1x8x4xf32> to vector<8x8x4xf32>
    %27 = vector.extract_strided_slice %21 {offsets = [0, 1, 0, 0], sizes = [8, 1, 8, 4], strides = [1, 1, 1, 1]} : vector<8x2x8x4xf32> to vector<8x1x8x4xf32>
    %28 = vector.shape_cast %27 : vector<8x1x8x4xf32> to vector<8x8x4xf32>
    %29 = vector.extract_strided_slice %24 {offsets = [0, 0, 0, 0], sizes = [8, 1, 8, 4], strides = [1, 1, 1, 1]} : vector<8x2x8x4xf32> to vector<8x1x8x4xf32>
    %30 = vector.shape_cast %29 : vector<8x1x8x4xf32> to vector<8x8x4xf32>
    %31 = vector.extract_strided_slice %24 {offsets = [0, 1, 0, 0], sizes = [8, 1, 8, 4], strides = [1, 1, 1, 1]} : vector<8x2x8x4xf32> to vector<8x1x8x4xf32>
    %32 = vector.shape_cast %31 : vector<8x1x8x4xf32> to vector<8x8x4xf32>
    %cst_15 = arith.constant 0.000000e+00 : f32
    %33 = vector.broadcast %cst_15 : f32 to vector<9x9x4xf32>
    %c0_16 = arith.constant 0 : index
    %c0_17 = arith.constant 0 : index
    %c0_18 = arith.constant 0 : index
    %34 = vector.load %arg10[%c0_16, %c0_17, %c0_18] : memref<9x9x4xf32, #tpu.memory_space<vmem>>, vector<9x9x4xf32>
    tpu.vector_store %arg10[%c0_16, %c0_17, %c0_18], %33 {strides = array<i32>} : memref<9x9x4xf32, #tpu.memory_space<vmem>>, vector<9x9x4xf32>,
    %cst_19 = arith.constant 0.000000e+00 : f32
    %35 = vector.broadcast %cst_19 : f32 to vector<9x8x4xf32>
    %c0_20 = arith.constant 0 : index
    %c0_21 = arith.constant 0 : index
    %c0_22 = arith.constant 0 : index
    %36 = vector.load %arg11[%c0_20, %c0_21, %c0_22] : memref<9x8x4xf32, #tpu.memory_space<vmem>>, vector<9x8x4xf32>
    tpu.vector_store %arg11[%c0_20, %c0_21, %c0_22], %35 {strides = array<i32>} : memref<9x8x4xf32, #tpu.memory_space<vmem>>, vector<9x8x4xf32>,
    %cst_23 = arith.constant 0.000000e+00 : f32
    %37 = vector.broadcast %cst_23 : f32 to vector<8x9x4xf32>
    %c0_24 = arith.constant 0 : index
    %c0_25 = arith.constant 0 : index
    %c0_26 = arith.constant 0 : index
    %38 = vector.load %arg12[%c0_24, %c0_25, %c0_26] : memref<8x9x4xf32, #tpu.memory_space<vmem>>, vector<8x9x4xf32>
    tpu.vector_store %arg12[%c0_24, %c0_25, %c0_26], %37 {strides = array<i32>} : memref<8x9x4xf32, #tpu.memory_space<vmem>>, vector<8x9x4xf32>,
    %c1 = arith.constant 1 : index
    %c1_27 = arith.constant 1 : index
    %c0_28 = arith.constant 0 : index
    %39 = vector.load %arg10[%c1, %c1_27, %c0_28] : memref<9x9x4xf32, #tpu.memory_space<vmem>>, vector<8x8x4xf32>
    tpu.vector_store %arg10[%c1, %c1_27, %c0_28], %32 {strides = array<i32>} : memref<9x9x4xf32, #tpu.memory_space<vmem>>, vector<8x8x4xf32>,
    %c1_29 = arith.constant 1 : index
    %c0_30 = arith.constant 0 : index
    %c0_31 = arith.constant 0 : index
    %40 = vector.load %arg11[%c1_29, %c0_30, %c0_31] : memref<9x8x4xf32, #tpu.memory_space<vmem>>, vector<8x8x4xf32>
    tpu.vector_store %arg11[%c1_29, %c0_30, %c0_31], %28 {strides = array<i32>} : memref<9x8x4xf32, #tpu.memory_space<vmem>>, vector<8x8x4xf32>,
    %c0_32 = arith.constant 0 : index
    %c1_33 = arith.constant 1 : index
    %c0_34 = arith.constant 0 : index
    %41 = vector.load %arg12[%c0_32, %c1_33, %c0_34] : memref<8x9x4xf32, #tpu.memory_space<vmem>>, vector<8x8x4xf32>
    tpu.vector_store %arg12[%c0_32, %c1_33, %c0_34], %30 {strides = array<i32>} : memref<8x9x4xf32, #tpu.memory_space<vmem>>, vector<8x8x4xf32>,
    %cst_35 = arith.constant 0.000000e+00 : f32
    %42 = vector.broadcast %cst_35 : f32 to vector<64x8xf32>
    %c0_36 = arith.constant 0 : index
    %c0_37 = arith.constant 0 : index
    %43 = vector.load %arg9[%c0_36, %c0_37] : memref<64x8xf32, #tpu.memory_space<vmem>>, vector<64x8xf32>
    tpu.vector_store %arg9[%c0_36, %c0_37], %42 {strides = array<i32>} : memref<64x8xf32, #tpu.memory_space<vmem>>, vector<64x8xf32>,
    %c0_38 = arith.constant 0 : index
    %c0_39 = arith.constant 0 : index
    %c0_40 = arith.constant 0 : index
    %44 = vector.load %arg10[%c0_38, %c0_39, %c0_40] : memref<9x9x4xf32, #tpu.memory_space<vmem>>, vector<8x8x4xf32>
    %c0_41 = arith.constant 0 : index
    %c0_42 = arith.constant 0 : index
    %45 = vector.load %arg9[%c0_41, %c0_42] : memref<64x8xf32, #tpu.memory_space<vmem>>, vector<64x8xf32>
    %46 = vector.shape_cast %44 : vector<8x8x4xf32> to vector<64x4xf32>
    %c0_43 = arith.constant 0 : index
    %c0_44 = arith.constant 0 : index
    %c0_45 = arith.constant 0 : index
    %47 = vector.load %arg6[%c0_43, %c0_44, %c0_45] : memref<9x4x8xf32, #tpu.memory_space<vmem>>, vector<1x4x8xf32>
    %48 = vector.shape_cast %47 : vector<1x4x8xf32> to vector<4x8xf32>
    %cst_46 = arith.constant dense<0.000000e+00> : vector<64x8xf32>
    %49 = tpu.matmul %46, %48, %cst_46 {dimension_numbers = #tpu.dot_dimension_numbers<[1], [0], [0], [1], [0, 0, 1, 1], [], []>} : vector<64x4xf32>, vector<4x8xf32>, vector<64x8xf32> -> vector<64x8xf32>
    %50 = arith.addf %45, %49 : vector<64x8xf32>
    %c0_47 = arith.constant 0 : index
    %c0_48 = arith.constant 0 : index
    %51 = vector.load %arg9[%c0_47, %c0_48] : memref<64x8xf32, #tpu.memory_space<vmem>>, vector<64x8xf32>
    tpu.vector_store %arg9[%c0_47, %c0_48], %50 {strides = array<i32>} : memref<64x8xf32, #tpu.memory_space<vmem>>, vector<64x8xf32>,
    %c0_49 = arith.constant 0 : index
    %c0_50 = arith.constant 0 : index
    %c0_51 = arith.constant 0 : index
    %52 = vector.load %arg11[%c0_49, %c0_50, %c0_51] : memref<9x8x4xf32, #tpu.memory_space<vmem>>, vector<8x8x4xf32>
    %c0_52 = arith.constant 0 : index
    %c0_53 = arith.constant 0 : index
    %53 = vector.load %arg9[%c0_52, %c0_53] : memref<64x8xf32, #tpu.memory_space<vmem>>, vector<64x8xf32>
    %54 = vector.shape_cast %52 : vector<8x8x4xf32> to vector<64x4xf32>
    %c1_54 = arith.constant 1 : index
    %c0_55 = arith.constant 0 : index
    %c0_56 = arith.constant 0 : index
    %55 = vector.load %arg6[%c1_54, %c0_55, %c0_56] : memref<9x4x8xf32, #tpu.memory_space<vmem>>, vector<1x4x8xf32>
    %56 = vector.shape_cast %55 : vector<1x4x8xf32> to vector<4x8xf32>
    %cst_57 = arith.constant dense<0.000000e+00> : vector<64x8xf32>
    %57 = tpu.matmul %54, %56, %cst_57 {dimension_numbers = #tpu.dot_dimension_numbers<[1], [0], [0], [1], [0, 0, 1, 1], [], []>} : vector<64x4xf32>, vector<4x8xf32>, vector<64x8xf32> -> vector<64x8xf32>
    %58 = arith.addf %53, %57 : vector<64x8xf32>
    %c0_58 = arith.constant 0 : index
    %c0_59 = arith.constant 0 : index
    %59 = vector.load %arg9[%c0_58, %c0_59] : memref<64x8xf32, #tpu.memory_space<vmem>>, vector<64x8xf32>
    tpu.vector_store %arg9[%c0_58, %c0_59], %58 {strides = array<i32>} : memref<64x8xf32, #tpu.memory_space<vmem>>, vector<64x8xf32>,
    %c0_60 = arith.constant 0 : index
    %c1_61 = arith.constant 1 : index
    %c0_62 = arith.constant 0 : index
    %60 = vector.load %arg10[%c0_60, %c1_61, %c0_62] : memref<9x9x4xf32, #tpu.memory_space<vmem>>, vector<8x8x4xf32>
    %c0_63 = arith.constant 0 : index
    %c0_64 = arith.constant 0 : index
    %61 = vector.load %arg9[%c0_63, %c0_64] : memref<64x8xf32, #tpu.memory_space<vmem>>, vector<64x8xf32>
    %62 = vector.shape_cast %60 : vector<8x8x4xf32> to vector<64x4xf32>
    %c2 = arith.constant 2 : index
    %c0_65 = arith.constant 0 : index
    %c0_66 = arith.constant 0 : index
    %63 = vector.load %arg6[%c2, %c0_65, %c0_66] : memref<9x4x8xf32, #tpu.memory_space<vmem>>, vector<1x4x8xf32>
    %64 = vector.shape_cast %63 : vector<1x4x8xf32> to vector<4x8xf32>
    %cst_67 = arith.constant dense<0.000000e+00> : vector<64x8xf32>
    %65 = tpu.matmul %62, %64, %cst_67 {dimension_numbers = #tpu.dot_dimension_numbers<[1], [0], [0], [1], [0, 0, 1, 1], [], []>} : vector<64x4xf32>, vector<4x8xf32>, vector<64x8xf32> -> vector<64x8xf32>
    %66 = arith.addf %61, %65 : vector<64x8xf32>
    %c0_68 = arith.constant 0 : index
    %c0_69 = arith.constant 0 : index
    %67 = vector.load %arg9[%c0_68, %c0_69] : memref<64x8xf32, #tpu.memory_space<vmem>>, vector<64x8xf32>
    tpu.vector_store %arg9[%c0_68, %c0_69], %66 {strides = array<i32>} : memref<64x8xf32, #tpu.memory_space<vmem>>, vector<64x8xf32>,
    %c0_70 = arith.constant 0 : index
    %c0_71 = arith.constant 0 : index
    %c0_72 = arith.constant 0 : index
    %68 = vector.load %arg12[%c0_70, %c0_71, %c0_72] : memref<8x9x4xf32, #tpu.memory_space<vmem>>, vector<8x8x4xf32>
    %c0_73 = arith.constant 0 : index
    %c0_74 = arith.constant 0 : index
    %69 = vector.load %arg9[%c0_73, %c0_74] : memref<64x8xf32, #tpu.memory_space<vmem>>, vector<64x8xf32>
    %70 = vector.shape_cast %68 : vector<8x8x4xf32> to vector<64x4xf32>
    %c3 = arith.constant 3 : index
    %c0_75 = arith.constant 0 : index
    %c0_76 = arith.constant 0 : index
    %71 = vector.load %arg6[%c3, %c0_75, %c0_76] : memref<9x4x8xf32, #tpu.memory_space<vmem>>, vector<1x4x8xf32>
    %72 = vector.shape_cast %71 : vector<1x4x8xf32> to vector<4x8xf32>
    %cst_77 = arith.constant dense<0.000000e+00> : vector<64x8xf32>
    %73 = tpu.matmul %70, %72, %cst_77 {dimension_numbers = #tpu.dot_dimension_numbers<[1], [0], [0], [1], [0, 0, 1, 1], [], []>} : vector<64x4xf32>, vector<4x8xf32>, vector<64x8xf32> -> vector<64x8xf32>
    %74 = arith.addf %69, %73 : vector<64x8xf32>
    %c0_78 = arith.constant 0 : index
    %c0_79 = arith.constant 0 : index
    %75 = vector.load %arg9[%c0_78, %c0_79] : memref<64x8xf32, #tpu.memory_space<vmem>>, vector<64x8xf32>
    tpu.vector_store %arg9[%c0_78, %c0_79], %74 {strides = array<i32>} : memref<64x8xf32, #tpu.memory_space<vmem>>, vector<64x8xf32>,
    %c0_80 = arith.constant 0 : index
    %c0_81 = arith.constant 0 : index
    %76 = vector.load %arg9[%c0_80, %c0_81] : memref<64x8xf32, #tpu.memory_space<vmem>>, vector<64x8xf32>
    %77 = vector.shape_cast %26 : vector<8x8x4xf32> to vector<64x4xf32>
    %c4 = arith.constant 4 : index
    %c0_82 = arith.constant 0 : index
    %c0_83 = arith.constant 0 : index
    %78 = vector.load %arg6[%c4, %c0_82, %c0_83] : memref<9x4x8xf32, #tpu.memory_space<vmem>>, vector<1x4x8xf32>
    %79 = vector.shape_cast %78 : vector<1x4x8xf32> to vector<4x8xf32>
    %cst_84 = arith.constant dense<0.000000e+00> : vector<64x8xf32>
    %80 = tpu.matmul %77, %79, %cst_84 {dimension_numbers = #tpu.dot_dimension_numbers<[1], [0], [0], [1], [0, 0, 1, 1], [], []>} : vector<64x4xf32>, vector<4x8xf32>, vector<64x8xf32> -> vector<64x8xf32>
    %81 = arith.addf %76, %80 : vector<64x8xf32>
    %c0_85 = arith.constant 0 : index
    %c0_86 = arith.constant 0 : index
    %82 = vector.load %arg9[%c0_85, %c0_86] : memref<64x8xf32, #tpu.memory_space<vmem>>, vector<64x8xf32>
    tpu.vector_store %arg9[%c0_85, %c0_86], %81 {strides = array<i32>} : memref<64x8xf32, #tpu.memory_space<vmem>>, vector<64x8xf32>,
    %c0_87 = arith.constant 0 : index
    %c1_88 = arith.constant 1 : index
    %c0_89 = arith.constant 0 : index
    %83 = vector.load %arg12[%c0_87, %c1_88, %c0_89] : memref<8x9x4xf32, #tpu.memory_space<vmem>>, vector<8x8x4xf32>
    %c0_90 = arith.constant 0 : index
    %c0_91 = arith.constant 0 : index
    %84 = vector.load %arg9[%c0_90, %c0_91] : memref<64x8xf32, #tpu.memory_space<vmem>>, vector<64x8xf32>
    %85 = vector.shape_cast %83 : vector<8x8x4xf32> to vector<64x4xf32>
    %c5 = arith.constant 5 : index
    %c0_92 = arith.constant 0 : index
    %c0_93 = arith.constant 0 : index
    %86 = vector.load %arg6[%c5, %c0_92, %c0_93] : memref<9x4x8xf32, #tpu.memory_space<vmem>>, vector<1x4x8xf32>
    %87 = vector.shape_cast %86 : vector<1x4x8xf32> to vector<4x8xf32>
    %cst_94 = arith.constant dense<0.000000e+00> : vector<64x8xf32>
    %88 = tpu.matmul %85, %87, %cst_94 {dimension_numbers = #tpu.dot_dimension_numbers<[1], [0], [0], [1], [0, 0, 1, 1], [], []>} : vector<64x4xf32>, vector<4x8xf32>, vector<64x8xf32> -> vector<64x8xf32>
    %89 = arith.addf %84, %88 : vector<64x8xf32>
    %c0_95 = arith.constant 0 : index
    %c0_96 = arith.constant 0 : index
    %90 = vector.load %arg9[%c0_95, %c0_96] : memref<64x8xf32, #tpu.memory_space<vmem>>, vector<64x8xf32>
    tpu.vector_store %arg9[%c0_95, %c0_96], %89 {strides = array<i32>} : memref<64x8xf32, #tpu.memory_space<vmem>>, vector<64x8xf32>,
    %c1_97 = arith.constant 1 : index
    %c0_98 = arith.constant 0 : index
    %c0_99 = arith.constant 0 : index
    %91 = vector.load %arg10[%c1_97, %c0_98, %c0_99] : memref<9x9x4xf32, #tpu.memory_space<vmem>>, vector<8x8x4xf32>
    %c0_100 = arith.constant 0 : index
    %c0_101 = arith.constant 0 : index
    %92 = vector.load %arg9[%c0_100, %c0_101] : memref<64x8xf32, #tpu.memory_space<vmem>>, vector<64x8xf32>
    %93 = vector.shape_cast %91 : vector<8x8x4xf32> to vector<64x4xf32>
    %c6 = arith.constant 6 : index
    %c0_102 = arith.constant 0 : index
    %c0_103 = arith.constant 0 : index
    %94 = vector.load %arg6[%c6, %c0_102, %c0_103] : memref<9x4x8xf32, #tpu.memory_space<vmem>>, vector<1x4x8xf32>
    %95 = vector.shape_cast %94 : vector<1x4x8xf32> to vector<4x8xf32>
    %cst_104 = arith.constant dense<0.000000e+00> : vector<64x8xf32>
    %96 = tpu.matmul %93, %95, %cst_104 {dimension_numbers = #tpu.dot_dimension_numbers<[1], [0], [0], [1], [0, 0, 1, 1], [], []>} : vector<64x4xf32>, vector<4x8xf32>, vector<64x8xf32> -> vector<64x8xf32>
    %97 = arith.addf %92, %96 : vector<64x8xf32>
    %c0_105 = arith.constant 0 : index
    %c0_106 = arith.constant 0 : index
    %98 = vector.load %arg9[%c0_105, %c0_106] : memref<64x8xf32, #tpu.memory_space<vmem>>, vector<64x8xf32>
    tpu.vector_store %arg9[%c0_105, %c0_106], %97 {strides = array<i32>} : memref<64x8xf32, #tpu.memory_space<vmem>>, vector<64x8xf32>,
    %c1_107 = arith.constant 1 : index
    %c0_108 = arith.constant 0 : index
    %c0_109 = arith.constant 0 : index
    %99 = vector.load %arg11[%c1_107, %c0_108, %c0_109] : memref<9x8x4xf32, #tpu.memory_space<vmem>>, vector<8x8x4xf32>
    %c0_110 = arith.constant 0 : index
    %c0_111 = arith.constant 0 : index
    %100 = vector.load %arg9[%c0_110, %c0_111] : memref<64x8xf32, #tpu.memory_space<vmem>>, vector<64x8xf32>
    %101 = vector.shape_cast %99 : vector<8x8x4xf32> to vector<64x4xf32>
    %c7 = arith.constant 7 : index
    %c0_112 = arith.constant 0 : index
    %c0_113 = arith.constant 0 : index
    %102 = vector.load %arg6[%c7, %c0_112, %c0_113] : memref<9x4x8xf32, #tpu.memory_space<vmem>>, vector<1x4x8xf32>
    %103 = vector.shape_cast %102 : vector<1x4x8xf32> to vector<4x8xf32>
    %cst_114 = arith.constant dense<0.000000e+00> : vector<64x8xf32>
    %104 = tpu.matmul %101, %103, %cst_114 {dimension_numbers = #tpu.dot_dimension_numbers<[1], [0], [0], [1], [0, 0, 1, 1], [], []>} : vector<64x4xf32>, vector<4x8xf32>, vector<64x8xf32> -> vector<64x8xf32>
    %105 = arith.addf %100, %104 : vector<64x8xf32>
    %c0_115 = arith.constant 0 : index
    %c0_116 = arith.constant 0 : index
    %106 = vector.load %arg9[%c0_115, %c0_116] : memref<64x8xf32, #tpu.memory_space<vmem>>, vector<64x8xf32>
    tpu.vector_store %arg9[%c0_115, %c0_116], %105 {strides = array<i32>} : memref<64x8xf32, #tpu.memory_space<vmem>>, vector<64x8xf32>,
    %c1_117 = arith.constant 1 : index
    %c1_118 = arith.constant 1 : index
    %c0_119 = arith.constant 0 : index
    %107 = vector.load %arg10[%c1_117, %c1_118, %c0_119] : memref<9x9x4xf32, #tpu.memory_space<vmem>>, vector<8x8x4xf32>
    %c0_120 = arith.constant 0 : index
    %c0_121 = arith.constant 0 : index
    %108 = vector.load %arg9[%c0_120, %c0_121] : memref<64x8xf32, #tpu.memory_space<vmem>>, vector<64x8xf32>
    %109 = vector.shape_cast %107 : vector<8x8x4xf32> to vector<64x4xf32>
    %c8 = arith.constant 8 : index
    %c0_122 = arith.constant 0 : index
    %c0_123 = arith.constant 0 : index
    %110 = vector.load %arg6[%c8, %c0_122, %c0_123] : memref<9x4x8xf32, #tpu.memory_space<vmem>>, vector<1x4x8xf32>
    %111 = vector.shape_cast %110 : vector<1x4x8xf32> to vector<4x8xf32>
    %cst_124 = arith.constant dense<0.000000e+00> : vector<64x8xf32>
    %112 = tpu.matmul %109, %111, %cst_124 {dimension_numbers = #tpu.dot_dimension_numbers<[1], [0], [0], [1], [0, 0, 1, 1], [], []>} : vector<64x4xf32>, vector<4x8xf32>, vector<64x8xf32> -> vector<64x8xf32>
    %113 = arith.addf %108, %112 : vector<64x8xf32>
    %c0_125 = arith.constant 0 : index
    %c0_126 = arith.constant 0 : index
    %114 = vector.load %arg9[%c0_125, %c0_126] : memref<64x8xf32, #tpu.memory_space<vmem>>, vector<64x8xf32>
    tpu.vector_store %arg9[%c0_125, %c0_126], %113 {strides = array<i32>} : memref<64x8xf32, #tpu.memory_space<vmem>>, vector<64x8xf32>,
    %c0_127 = arith.constant 0 : index
    %c0_128 = arith.constant 0 : index
    %115 = vector.load %arg9[%c0_127, %c0_128] : memref<64x8xf32, #tpu.memory_space<vmem>>, vector<64x8xf32>
    %c0_129 = arith.constant 0 : index
    %c0_130 = arith.constant 0 : index
    %116 = vector.load %arg7[%c0_129, %c0_130] : memref<1x8xf32, #tpu.memory_space<vmem>>, vector<1x8xf32>
    %117 = vector.broadcast %116 : vector<1x8xf32> to vector<64x8xf32>
    %118 = arith.addf %115, %117 : vector<64x8xf32>
    %cst_131 = arith.constant 0.000000e+00 : f32
    %119 = vector.broadcast %cst_131 : f32 to vector<64x8xf32>
    %120 = arith.maximumf %118, %119 : vector<64x8xf32>
    %121 = vector.shape_cast %120 : vector<64x8xf32> to vector<1x8x8x8xf32>
    %c0_132 = arith.constant 0 : index
    %c0_133 = arith.constant 0 : index
    %c0_134 = arith.constant 0 : index
    %c0_135 = arith.constant 0 : index
    %122 = vector.load %arg8[%c0_132, %c0_133, %c0_134, %c0_135] : memref<1x8x8x8xf32, #tpu.memory_space<vmem>>, vector<1x8x8x8xf32>
    tpu.vector_store %arg8[%c0_132, %c0_133, %c0_134, %c0_135], %121 {strides = array<i32>} : memref<1x8x8x8xf32, #tpu.memory_space<vmem>>, vector<1x8x8x8xf32>,
    return
  }
  func.func @transform_0(%arg0: i32) -> (i32, i32, i32, i32, i32) {
    %c0_i32 = arith.constant 0 : i32
    %c0_i32_0 = arith.constant 0 : i32
    %c0_i32_1 = arith.constant 0 : i32
    %c0_i32_2 = arith.constant 0 : i32
    %c0_i32_3 = arith.constant 0 : i32
    return %arg0, %c0_i32, %c0_i32_0, %c0_i32_1, %c0_i32_2 : i32, i32, i32, i32, i32
  }
  func.func @transform_1(%arg0: i32) -> (i32, i32) {
    %c0_i32 = arith.constant 0 : i32
    %c0_i32_0 = arith.constant 0 : i32
    %c0_i32_1 = arith.constant 0 : i32
    return %c0_i32, %c0_i32_0 : i32, i32
  }
  func.func @transform_2(%arg0: i32) -> (i32, i32) {
    %c0_i32 = arith.constant 0 : i32
    %c0_i32_0 = arith.constant 0 : i32
    %c0_i32_1 = arith.constant 0 : i32
    return %c0_i32, %c0_i32_0 : i32, i32
  }
  func.func @transform_3(%arg0: i32) -> (i32, i32) {
    %c0_i32 = arith.constant 0 : i32
    %c0_i32_0 = arith.constant 0 : i32
    %c0_i32_1 = arith.constant 0 : i32
    return %c0_i32, %c0_i32_0 : i32, i32
  }
  func.func @transform_4(%arg0: i32) -> (i32, i32) {
    %c0_i32 = arith.constant 0 : i32
    %c0_i32_0 = arith.constant 0 : i32
    %c0_i32_1 = arith.constant 0 : i32
    return %c0_i32, %c0_i32_0 : i32, i32
  }
  func.func @transform_5(%arg0: i32) -> (i32, i32, i32) {
    %c0_i32 = arith.constant 0 : i32
    %c0_i32_0 = arith.constant 0 : i32
    %c0_i32_1 = arith.constant 0 : i32
    %c0_i32_2 = arith.constant 0 : i32
    return %c0_i32, %c0_i32_0, %c0_i32_1 : i32, i32, i32
  }
  func.func @transform_6(%arg0: i32) -> (i32, i32) {
    %c0_i32 = arith.constant 0 : i32
    %c0_i32_0 = arith.constant 0 : i32
    %c0_i32_1 = arith.constant 0 : i32
    return %c0_i32, %c0_i32_0 : i32, i32
  }
  func.func @transform_7(%arg0: i32) -> (i32, i32, i32, i32) {
    %c0_i32 = arith.constant 0 : i32
    %c0_i32_0 = arith.constant 0 : i32
    %c0_i32_1 = arith.constant 0 : i32
    %c0_i32_2 = arith.constant 0 : i32
    return %arg0, %c0_i32, %c0_i32_0, %c0_i32_1 : i32, i32, i32, i32
  }
}

</mosaic_0001>

<bundles_post_ra>
// kernel: res_block_forward.1
= control target key start
LH: loop header
LB: loop body
LE: loop exit
PB: predicated region body
PF: predicated region fallthrough
CT: control target
= control target key end

     0   :  { %s4912_s0 = inlined_call_operand.hbm [shape: f32[2,16,2,8,4], index: 0, kind: input, shape index: {}]   ;;  %s4913_s1 = inlined_call_operand.hbm [shape: f32[4,8], index: 1, kind: input, shape index: {}]   ;;  %s4914_s2 = inlined_call_operand.hbm [shape: f32[1,8], index: 2, kind: input, shape index: {}]   ;;  %s4915_s3 = inlined_call_operand.hbm [shape: f32[8,4], index: 3, kind: input, shape index: {}]   ;;  %s4916_s4 = inlined_call_operand.hbm [shape: f32[1,4], index: 4, kind: input, shape index: {}]   ;;  %s4917_s5 = inlined_call_operand.hbm [shape: f32[9,4,8], index: 5, kind: input, shape index: {}]   ;;  %s4918_s6 = inlined_call_operand.hbm [shape: f32[1,8], index: 6, kind: input, shape index: {}]   ;;  %s4919_s7 = inlined_call_operand.hbm [shape: f32[2,8,8,8], index: 7, kind: output, shape index: {}]  }
   0x1   :  { %4923 = sst [smem:[#allocation24_spill]] %s4913_s1 }
   0x2   :  { %12 = vsyncpa [#allocation7], 0 }
   0x3   :  { %14 = vsyncpa [#allocation7 + $0x1], 0 }
   0x4   :  { %15 = vsyncpa [#allocation10], 0 }
   0x5   :  { %16 = vsyncpa [#allocation13], 0 }
   0x6   :  { %17 = vsyncpa [#allocation16], 0 }
   0x7   :  { %18 = vsyncpa [#allocation8], 0 }
   0x8   :  { %20 = vsyncpa [#allocation8 + $0x1], 0  ;;  %s3911_s24 = smov 0   ;;  %s3913_s25 = smov 0  }
   0x9   :  { %s3915_s26 = smov 0   ;;  %s3917_s27 = smov 0  }
   0xa LB: > { %s3856_s28 = smov [#allocation9]   ;;  %s3932_s30 = sadd.s32 4294967295, %s3854_s27   ;;  %s3854_s27 = sphi %s3917_s27, %s4947_s27   ;;  %s3850_s26 = sphi %s3915_s26, %s4946_s26   ;;  %s3846_s25 = sphi %s3913_s25, %s4945_s25   ;;  %s3842_s24 = sphi %s3911_s24, %s4944_s24  }
   0xb   : > { %s222_s29 = sshll.u32 %s3856_s28, 4  ;;  %p2913_p0 = scmp.ge.s32.totalorder %s3854_s27, 1  ;;  %s223_s29 = int_to_ptr.vmem [resolvable:$true] %s222_s29 }
   0xc   : > { %p4920_p1 = scmp.eq.s32.totalorder %s3932_s30, 0  ;;  %p209_p2 = scmp.lt.s32.totalorder %s3854_s27, 3 }
   0xd   : > { %s3857_s9 = smov [#allocation12]   ;;  %s3858_s11 = smov [#allocation15]  }
   0xe   : > { %p3937_p3 = pnand %p2913_p0, %p209_p2  ;;  %s244_s10 = sshll.u32 %s3857_s9, 4  ;;  %s3944_s10 = int_to_ptr.vmem [resolvable:$true] %s244_s10 }
   0xf   : > { %s265_s12 = sshll.u32 %s3858_s11, 4  ;;  %s4926_s1 = sld [smem:[#allocation24_spill]]  ;;  %s3952_s12 = int_to_ptr.vmem [resolvable:$true] %s265_s12 }
  0x10   : > { %s4924_s8 = scalar_select %p3937_p3, 1, 0 }
  0x11   : > { %p3492_p5 = pneg %p3937_p3 }
  0x13   : > { %p3948_p6 = pnand %p3492_p5, %p4920_p1 }
  0x15   : > { %s3578_s16 = scalar_lea.hbm %s4926_s1, 64  ;;  %p3962_p8 = pneg %p3948_p6 }
  0x16   : > { %p3579_p7 = scmp.ne.s32.totalorder %s4926_s1, %s3578_s16  ;;  %p3585_p11 = scmp.lt.u32.totalorder %s3578_s16, %s4926_s1 }
  0x18   : > { %p3581_p9 = pnand %p3962_p8, %p3579_p7 }
  0x1a   : > { %p3582_p10 = pneg %p3581_p9 }
  0x1c   : > { %p3587_p12 = pnand %p3585_p11, %p3582_p10 }
  0x1e   : > { %3590 = shalt.err (!%p3587_p12)
}
  0x1f   : > { %s3591_s22 = scalar_lea.vmem %s223_s29, 64  ;;  %p3599_p5 = scmp.lt.s32.totalorder %s223_s29, %s223_s29 }
  0x20   : > { %p3592_p13 = scmp.ne.s32.totalorder %s223_s29, %s3591_s22  ;;  %p3600_p4 = scmp.lt.s32.totalorder %s3591_s22, %s3591_s22 }
  0x22   : > { %p3594_p0 = pnand %p3592_p13, %p3962_p8  ;;  %p3601_p1 = por %p3600_p4, %p3599_p5 }
  0x24   : > { %p3595_p2 = pneg %p3594_p0 }
  0x26   : > { %p3602_p3 = pnand %p3601_p1, %p3595_p2 }
  0x28   : > { %3605 = shalt.err (!%p3602_p3)
}
  0x29   : > { %3495 = dma.hbm_to_vmem [thread:$0]  (!%p3948_p6), %s4926_s1, 64, %s223_s29, [#allocation10]  }
  0x2a   : > { %s3606_s14 = scalar_lea.hbm %s4915_s3, 128 }
  0x2b   : > { %p3607_p7 = scmp.ne.s32.totalorder %s4915_s3, %s3606_s14  ;;  %p3613_p1 = scmp.lt.u32.totalorder %s3606_s14, %s4915_s3 }
  0x2d   : > { %p3609_p9 = pnand %p3607_p7, %p3962_p8 }
  0x2f   : > { %p3610_p4 = pneg %p3609_p9 }
  0x31   : > { %p3615_p3 = pnand %p3613_p1, %p3610_p4 }
  0x33   : > { %3618 = shalt.err (!%p3615_p3)
}
  0x34   : > { %s3619_s29 = scalar_lea.vmem %s3944_s10, 128  ;;  %p3627_p13 = scmp.lt.s32.totalorder %s3944_s10, %s3944_s10 }
  0x35   : > { %p3620_p10 = scmp.ne.s32.totalorder %s3944_s10, %s3619_s29  ;;  %p3628_p0 = scmp.lt.s32.totalorder %s3619_s29, %s3619_s29 }
  0x37   : > { %p3622_p11 = pnand %p3620_p10, %p3962_p8  ;;  %p3629_p2 = por %p3628_p0, %p3627_p13 }
  0x39   : > { %p3623_p12 = pneg %p3622_p11 }
  0x3b   : > { %p3630_p5 = pnand %p3629_p2, %p3623_p12 }
  0x3d   : > { %3633 = shalt.err (!%p3630_p5)
}
  0x3e   : > { %3501 = dma.hbm_to_vmem [thread:$0]  (!%p3948_p6), %s4915_s3, 128, %s3944_s10, [#allocation13]  }
  0x3f   : > { %s3634_s28 = scalar_lea.hbm %s4917_s5, 576 }
  0x40   : > { %p3635_p7 = scmp.ne.s32.totalorder %s4917_s5, %s3634_s28  ;;  %p3641_p1 = scmp.lt.u32.totalorder %s3634_s28, %s4917_s5 }
  0x42   : > { %p3637_p9 = pnand %p3635_p7, %p3962_p8 }
  0x44   : > { %p3638_p4 = pneg %p3637_p9 }
  0x46   : > { %p3643_p3 = pnand %p3641_p1, %p3638_p4 }
  0x48   : > { %3646 = shalt.err (!%p3643_p3)
}
  0x49   : > { %s3647_s10 = scalar_lea.vmem %s3952_s12, 576  ;;  %p3655_p13 = scmp.lt.s32.totalorder %s3952_s12, %s3952_s12 }
  0x4a   : > { %p3648_p10 = scmp.ne.s32.totalorder %s3952_s12, %s3647_s10  ;;  %p3656_p0 = scmp.lt.s32.totalorder %s3647_s10, %s3647_s10 }
  0x4c   : > { %p3650_p11 = pnand %p3648_p10, %p3962_p8  ;;  %p3657_p2 = por %p3656_p0, %p3655_p13 }
  0x4e   : > { %p3651_p12 = pneg %p3650_p11 }
  0x50   : > { %p3658_p5 = pnand %p3657_p2, %p3651_p12 }
  0x52   : > { %3661 = shalt.err (!%p3658_p5)
}
  0x53   : > { %s3859_s16 = smov 64   ;;  %s3860_s17 = smov 4  }
  0x54   : > { %3507 = dma.hbm_to_vmem [thread:$0]  (!%p3948_p6), %s4917_s5, 576, %s3952_s12, [#allocation16], %s3859_s16, %s3859_s16, %s3860_s17  }
  0x55   : > { %s3861_s20 = smov [#allocation11]   ;;  %s3862_s22 = smov [#allocation14]  }
  0x56   : > { %s233_s21 = sshll.u32 %s3861_s20, 4  ;;  %s255_s23 = sshll.u32 %s3862_s22, 4  ;;  %s234_s21 = int_to_ptr.vmem [resolvable:$true] %s233_s21  ;;  %s256_s23 = int_to_ptr.vmem [resolvable:$true] %s255_s23 }
  0x57   : > { %s3662_s11 = scalar_lea.hbm %s4914_s2, 16 }
  0x58   : > { %p3663_p7 = scmp.ne.s32.totalorder %s4914_s2, %s3662_s11  ;;  %p3669_p1 = scmp.lt.u32.totalorder %s3662_s11, %s4914_s2 }
  0x5a   : > { %p3665_p9 = pnand %p3663_p7, %p3962_p8 }
  0x5c   : > { %p3666_p4 = pneg %p3665_p9 }
  0x5e   : > { %p3671_p3 = pnand %p3669_p1, %p3666_p4 }
  0x60   : > { %3674 = shalt.err (!%p3671_p3)
}
  0x61   : > { %s3675_s12 = scalar_lea.vmem %s234_s21, 16  ;;  %s3682_s16 = scalar_lea.vmem %s234_s21, 32 }
  0x62   : > { %p3676_p10 = scmp.ne.s32.totalorder %s234_s21, %s3675_s12  ;;  %p3683_p13 = scmp.lt.s32.totalorder %s234_s21, %s234_s21 }
  0x63   : > { %p3684_p0 = scmp.lt.s32.totalorder %s3682_s16, %s3675_s12 }
  0x64   : > { %p3678_p11 = pnand %p3676_p10, %p3962_p8 }
  0x65   : > { %p3685_p2 = por %p3684_p0, %p3683_p13 }
  0x66   : > { %p3679_p12 = pneg %p3678_p11 }
  0x68   : > { %p3686_p5 = pnand %p3685_p2, %p3679_p12 }
  0x6a   : > { %3689 = shalt.err (!%p3686_p5)
}
  0x6b   : > { %3498 = dma.hbm_to_vmem [thread:$0]  (!%p3948_p6), %s4914_s2, 16, %s234_s21, [#allocation10]  }
  0x6c   : > { %s3690_s20 = scalar_lea.hbm %s4916_s4, 16 }
  0x6d   : > { %p3691_p7 = scmp.ne.s32.totalorder %s4916_s4, %s3690_s20  ;;  %p3697_p1 = scmp.lt.u32.totalorder %s3690_s20, %s4916_s4 }
  0x6f   : > { %p3693_p9 = pnand %p3691_p7, %p3962_p8 }
  0x71   : > { %p3694_p4 = pneg %p3693_p9 }
  0x73   : > { %p3699_p3 = pnand %p3697_p1, %p3694_p4 }
  0x75   : > { %3702 = shalt.err (!%p3699_p3)
}
  0x76   : > { %s3703_s14 = scalar_lea.vmem %s256_s23, 16  ;;  %s3710_s21 = scalar_lea.vmem %s256_s23, 32 }
  0x77   : > { %p3704_p10 = scmp.ne.s32.totalorder %s256_s23, %s3703_s14  ;;  %p3711_p13 = scmp.lt.s32.totalorder %s256_s23, %s256_s23 }
  0x78   : > { %p3712_p0 = scmp.lt.s32.totalorder %s3710_s21, %s3703_s14 }
  0x79   : > { %p3706_p11 = pnand %p3704_p10, %p3962_p8 }
  0x7a   : > { %p3713_p2 = por %p3712_p0, %p3711_p13 }
  0x7b   : > { %p3707_p12 = pneg %p3706_p11 }
  0x7d   : > { %p3714_p5 = pnand %p3713_p2, %p3707_p12 }
  0x7f   : > { %3717 = shalt.err (!%p3714_p5)
}
  0x80   : > { %3504 = dma.hbm_to_vmem [thread:$0]  (!%p3948_p6), %s4916_s4, 16, %s256_s23, [#allocation13]  }
  0x81   : > { %s3863_s12 = smov [#allocation17]   ;;  %s3718_s1 = scalar_lea.hbm %s4918_s6, 16 }
  0x82   : > { %s279_s16 = sshll.u32 %s3863_s12, 4  ;;  %p3719_p7 = scmp.ne.s32.totalorder %s4918_s6, %s3718_s1  ;;  %s280_s16 = int_to_ptr.vmem [resolvable:$true] %s279_s16 }
  0x83   : > { %p3725_p1 = scmp.lt.u32.totalorder %s3718_s1, %s4918_s6 }
  0x84   : > { %p3721_p9 = pnand %p3719_p7, %p3962_p8 }
  0x86   : > { %p3722_p4 = pneg %p3721_p9 }
  0x88   : > { %p3727_p3 = pnand %p3725_p1, %p3722_p4 }
  0x8a   : > { %3730 = shalt.err (!%p3727_p3)
}
  0x8b   : > { %s3731_s23 = scalar_lea.vmem %s280_s16, 16  ;;  %s3738_s9 = scalar_lea.vmem %s280_s16, 32 }
  0x8c   : > { %p3732_p10 = scmp.ne.s32.totalorder %s280_s16, %s3731_s23  ;;  %p3739_p13 = scmp.lt.s32.totalorder %s280_s16, %s280_s16 }
  0x8d   : > { %p3740_p0 = scmp.lt.s32.totalorder %s3738_s9, %s3731_s23 }
  0x8e   : > { %p3734_p11 = pnand %p3732_p10, %p3962_p8 }
  0x8f   : > { %p3741_p2 = por %p3740_p0, %p3739_p13 }
  0x90   : > { %p3735_p12 = pneg %p3734_p11 }
  0x92   : > { %p3742_p5 = pnand %p3741_p2, %p3735_p12 }
  0x94   : > { %3745 = shalt.err (!%p3742_p5)
}
  0x95   : > { %3510 = dma.hbm_to_vmem [thread:$0]  (!%p3948_p6), %s4918_s6, 16, %s280_s16, [#allocation16]  }
  0x96   : > { %s2912_s19 = sadd.s32 4294967294, %s3854_s27   ;;  %s4080_s13 = sadd.s32 1, %s3854_s27  }
  0x97   : > { %s30_s21 = ssub.s32 %s3854_s27, %s4080_s13  ;;  %s33_s15 = sadd.s32 1, %s3850_s26 }
  0x98   : > { %p31_p8 = scmp.eq.s32.totalorder %s30_s21, 0  ;;  %p40_p7 = scmp.ne.s32.totalorder %s3850_s26, %s3846_s25 }
  0x99   : > { %p41_p9 = scmp.eq.s32.totalorder %s3854_s27, 0  ;;  %p46_p4 = scmp.ne.s32.totalorder %s3846_s25, %s3842_s24 }
  0x9a   : > { %s4091_s10 = scalar_select %p31_p8, %s3850_s26, %s33_s15  }
  0x9b   : > { %p4093_p1 = por %p41_p9, %p40_p7  ;;  %p4929_p3 = scmp.eq.s32.totalorder %s3932_s30, 0 }
  0x9c   : > { %p196_p10 = scmp.eq.s32.totalorder %s3932_s30, 1  ;;  %p202_p11 = scmp.eq.s32.totalorder %s2912_s19, 1 }
  0x9d   : > { %p4099_p6 = por %p4929_p3, %p46_p4  ;;  %p3525_p12 = scmp.lt.s32.totalorder %s3854_s27, 2 }
  0x9e   : > { %s290_s17 = sand.u32 1, %s3850_s26   ;;  %p4106_p13 = por %p196_p10, %p40_p7 }
  0x9f   : > { %p4110_p0 = por %p202_p11, %p46_p4  ;;  %s2921_s29 = sshll.u32 %s290_s17, 8 }
  0xa0   : > { %s4931_s18 = scalar_select %p4106_p13, 1, 0 }
  0xa1   : > { %s4932_s1 = scalar_select %p4110_p0, 1, 0 }
  0xa2   : > { %s3087_s20 = sshll.u32 %s3854_s27, 12  ;;  %s294_s9 = scalar_lea.vmem [#allocation6], %s2921_s29 }
  0xa3   : > { %s4118_s23 = scalar_lea.hbm %s4912_s0, %s3087_s20  ;;  %s301_s11 = sshll.u32 %s294_s9, 4  ;;  %s4120_s11 = int_to_ptr.vmem [resolvable:$true] %s301_s11 }
  0xa4   : > { %p4124_p2 = pnand %p3525_p12, %p4093_p1  ;;  %s4128_s19 = scalar_lea.sflag [#allocation7], %s290_s17 }
  0xa5   : > { %s3746_s21 = scalar_lea.hbm %s4118_s23, 4096  ;;  %s3751_s12 = scalar_lea.hbm %s4912_s0, 8192 }
  0xa6   : > { %p3747_p5 = scmp.ne.s32.totalorder %s4118_s23, %s3746_s21  ;;  %p3748_p8 = pneg %p4124_p2 }
  0xa7   : > { %p3752_p4 = scmp.lt.u32.totalorder %s4118_s23, %s4912_s0  ;;  %p3753_p1 = scmp.lt.u32.totalorder %s3751_s12, %s3746_s21 }
  0xa8   : > { %p3749_p7 = pnand %p3748_p8, %p3747_p5  ;;  %p3755_p10 = scmp.lt.u32.totalorder %s3746_s21, %s4118_s23 }
  0xa9   : > { %p3754_p3 = por %p3753_p1, %p3752_p4 }
  0xaa   : > { %p3750_p9 = pneg %p3749_p7 }
  0xab   : > { %p3756_p11 = por %p3755_p10, %p3754_p3 }
  0xad   : > { %p3757_p12 = pnand %p3756_p11, %p3750_p9 }
  0xaf   : > { %3760 = shalt.err (!%p3757_p12)
}
  0xb0   : > { %s3761_s17 = scalar_lea.vmem %s4120_s11, 4096  ;;  %s3864_s28 = smov [#allocation6]  }
  0xb1   : > { %p3762_p5 = scmp.ne.s32.totalorder %s4120_s11, %s3761_s17  ;;  %s3766_s9 = sshll.u32 %s3864_s28, 4  ;;  %s3767_s9 = int_to_ptr.vmem [resolvable:$false] %s3766_s9 }
  0xb2   : > { %s3768_s15 = scalar_lea.vmem %s3767_s9, 8192  ;;  %p3769_p13 = scmp.lt.s32.totalorder %s4120_s11, %s3767_s9 }
  0xb3   : > { %p3764_p7 = pnand %p3762_p5, %p3748_p8  ;;  %p3770_p4 = scmp.lt.s32.totalorder %s3768_s15, %s3761_s17 }
  0xb5   : > { %p3765_p0 = pneg %p3764_p7  ;;  %p3771_p1 = por %p3770_p4, %p3769_p13 }
  0xb7   : > { %p3772_p3 = pnand %p3771_p1, %p3765_p0 }
  0xb9   : > { %3775 = shalt.err (!%p3772_p3)
}
  0xba   : > { %s3865_s21 = smov 128   ;;  %s3866_s29 = smov 8  }
  0xbb   : > { %3514 = dma.hbm_to_vmem [thread:$0]  (!%p4124_p2), %s4118_s23, 4096, %s4120_s11, %s4128_s19, %s3865_s21, %s3865_s21, %s3866_s29  }
  0xbc   : > { %p4934_p8 = scmp.ne.s32.totalorder %s4924_s8, 0 }
  0xbd   : > { %s4159_s12 = sand.u32 (!%p4934_p8), 1, %s3846_s25  }
  0xbe   : > { %313 = sbr.rel (%p4934_p8) target bundleno = 1029 (0x405), region = 48  ;;  %s2925_s20 = sshll.u32 (!%p4934_p8), %s4159_s12, 8 }
  0xbf   : > { %s316_s22 = scalar_lea.sflag (!%p4934_p8), [#allocation7], %s4159_s12  ;;  %s4163_s17 = scalar_lea.vmem (!%p4934_p8), [#allocation6], %s2925_s20 }
  0xc5   : > { %3821 = dma.done.wait (%p4099_p6), %s316_s22, 4096  }
  0xc6   : > { %3823 = vsyncadd (%p4099_p6), %s316_s22, 4294963200  ;;  %p4935_p13 = scmp.eq.s32.totalorder %s3932_s30, 0 }
  0xc8   : > { %3825 = dma.done.wait (%p4935_p13), [#allocation10], 80   ;;  %p4936_p0 = pmov %p4935_p13 }
  0xca   : > { %3827 = vsyncadd (%p4936_p0), [#allocation10], 4294967216  ;;  %p4937_p2 = pmov %p4936_p0 }
  0xcb   : > { %p4938_p9 = pmov %p4936_p0 }
  0xcc   : > { %3829 = dma.done.wait (%p4937_p2), [#allocation13], 144  }
  0xcd   : > { %3831 = vsyncadd (%p4938_p9), [#allocation13], 4294967152  ;;  %p4939_p10 = pmov %p4936_p0 }
  0xce   : > { %p4940_p11 = pmov %p4936_p0 }
  0xcf   : > { %3833 = dma.done.wait (%p4939_p10), [#allocation16], 592  }
  0xd0   : > { %3835 = vsyncadd (%p4940_p11), [#allocation16], 4294966704  ;;  %vm511_vm0 = vcmask 1043456   ;;  %vm414_vm1 = vcmask 31744   ;;  %v406_v0 = vld [vmem:[#allocation9] sm:$0xf] }
  0xd1   : > { %v4182_v1 = vld [vmem:[%s4163_s17] sm:$0xff]  ;;  %v4185_v2 = vld [vmem:[%s4163_s17 + $0x8] sm:$0xff]  ;;  %3236 = vmatprep.subr.msk.mxu0 %vm511_vm0, %v406_v0  ;;  %v4191_v3 = vld [vmem:[%s4163_s17 + $0x10] sm:$0xff]  ;;  %3462 = vmatprep.subr.msk.mxu1 %vm511_vm0, %v406_v0  ;;  %vm780_vm2 = vcmask 64512   ;;  %vm1167_vm3 = vcmask 24576   ;;  %s2932_s8 = sshll.u32 %s4159_s12, 6 }
  0xd2   : > { %3238 = vmatprep.mubr.msk.f32.mxu0 %vm414_vm1, %v4182_v1  ;;  %3237 = vmatpush3.msk.msra.mxu0 %vm511_vm0, %v406_v0  ;;  %v4201_v4 = vld [vmem:[%s4163_s17 + $0x18] sm:$0xff]  ;;  %v4204_v5 = vld [vmem:[%s4163_s17 + $0x20] sm:$0xff]  ;;  %v4211_v6 = vld [vmem:[%s4163_s17 + $0x28] sm:$0xff]  ;;  %s4841_s16 = scalar_lea.vmem [#allocation18], %s2932_s8  ;;  %s3088_s23 = sshll.u32 %s3932_s30, 10 }
  0xd3   : > { %3239 = vmatmul.mubr.msk.f32.vlgmr.msra.gmra.mrb[0].mxu0 %vm414_vm1, %v4185_v2  ;;  %3463 = vmatpush3.msk.msra.mxu1 %vm511_vm0, %v406_v0  ;;  %v4214_v7 = vld [vmem:[%s4163_s17 + $0x30] sm:$0xff]  ;;  %v4217_v8 = vld [vmem:[%s4163_s17 + $0xe0] sm:$0xff]  ;;  %v4222_v9 = vld [vmem:[%s4163_s17 + $0xe8] sm:$0xff]  ;;  %s2782_s11 = sshll.u32 %s4841_s16, 4  ;;  %s4862_s28 = scalar_lea.hbm %s4919_s7, %s3088_s23  ;;  %s4864_s11 = int_to_ptr.vmem [resolvable:$true] %s2782_s11 }
  0xd4   : > { %3241 = vmatprep.mubr.msk.f32.mxu0 %vm414_vm1, %v4191_v3  ;;  %3280 = vmatprep.mubr.msk.f32.mxu1 %vm414_vm1, %v4217_v8  ;;  %v4225_v10 = vld [vmem:[%s4163_s17 + $0xf0] sm:$0xff]  ;;  %v772_v11 = vld [vmem:[#allocation12] sm:$0xff]  ;;  %v4234_v12 = vld [vmem:[%s4163_s17 + $0x38] sm:$0xff]  ;;  %s2769_s30 = scalar_lea.sflag [#allocation8], %s4159_s12  ;;  %s3776_s9 = scalar_lea.vmem %s4864_s11, 1024 }
  0xd5   : > { %3281 = vmatmul.mubr.msk.f32.vlgmr.msra.gmra.mrb[0].mxu1 %vm414_vm1, %v4222_v9  ;;  %v4239_v13 = vld [vmem:[%s4163_s17 + $0xf8] sm:$0xff]  ;;  %v4242_v14 = vld [vmem:[%s4163_s17 + $0x40] sm:$0xff]  ;;  %3286 = vmatprep.subr.mxu1 %v772_v11  ;;  %v4251_v15 = vld [vmem:[%s4163_s17 + $0x48] sm:$0xff]  ;;  %p3777_p6 = scmp.ne.s32.totalorder %s4864_s11, %s3776_s9  ;;  %p4941_p12 = scmp.ne.s32.totalorder %s4931_s18, 0 }
  0xd6   : > { %3283 = vmatprep.mubr.msk.f32.mxu1 %vm414_vm1, %v4225_v10  ;;  %3287 = vmatpush3.msra.mxu1 %v772_v11  ;;  %v4254_v16 = vld [vmem:[%s4163_s17 + $0x50] sm:$0xff]  ;;  %v4261_v17 = vld [vmem:[%s4163_s17 + $0x58] sm:$0xff]  ;;  %v4264_v18 = vld [vmem:[%s4163_s17 + $0x60] sm:$0xff]  ;;  %s3868_s15 = smov [#allocation18]  }
  0xd7   : > { %3242 = vmatmul.mubr.msk.f32.gmra.mrb[2].mxu0 %vm414_vm1, %v4201_v4  ;;  %v4271_v19 = vld [vmem:[%s4163_s17 + $0x68] sm:$0xff]  ;;  %v4274_v20 = vld [vmem:[%s4163_s17 + $0x70] sm:$0xff]  ;;  %v4281_v21 = vld [vmem:[%s4163_s17 + $0x78] sm:$0xff]  ;;  %p3778_p5 = pnand %p3777_p6, %p4941_p12  ;;  %s3780_s21 = sshll.u32 %s3868_s15, 4  ;;  %s3781_s21 = int_to_ptr.vmem [resolvable:$false] %s3780_s21 }
  0xd8   : > { %3244 = vmatprep.mubr.msk.f32.mxu0 %vm414_vm1, %v4204_v5  ;;  %v4284_v22 = vld [vmem:[%s4163_s17 + $0x80] sm:$0xff]  ;;  %v4291_v23 = vld [vmem:[%s4163_s17 + $0x88] sm:$0xff]  ;;  %v4294_v24 = vld [vmem:[%s4163_s17 + $0x90] sm:$0xff]  ;;  %s3782_s29 = scalar_lea.vmem %s3781_s21, 2048  ;;  %p3783_p4 = scmp.lt.s32.totalorder %s4864_s11, %s3781_s21 }
  0xd9   : > { %3284 = vmatmul.mubr.msk.f32.gmra.mrb[2].mxu1 %vm414_vm1, %v4239_v13  ;;  %v4301_v25 = vld [vmem:[%s4163_s17 + $0x98] sm:$0xff]  ;;  %v4304_v26 = vld [vmem:[%s4163_s17 + $0xa0] sm:$0xff]  ;;  %v4311_v27 = vld [vmem:[%s4163_s17 + $0xa8] sm:$0xff]  ;;  %p3779_p7 = pneg %p3778_p5  ;;  %p3784_p1 = scmp.lt.s32.totalorder %s3782_s29, %s3776_s9 }
  0xda   : > { %v4314_v28 = vld [vmem:[%s4163_s17 + $0xb0] sm:$0xff]  ;;  %v4321_v29 = vld [vmem:[%s4163_s17 + $0xb8] sm:$0xff]  ;;  %v4324_v30 = vld [vmem:[%s4163_s17 + $0xc0] sm:$0xff] }
  0xdb   : > { %3245 = vmatmul.mubr.msk.f32.gmra.mrb[4].mxu0 %vm414_vm1, %v4211_v6  ;;  %v4331_v31 = vld [vmem:[%s4163_s17 + $0xc8] sm:$0xff]  ;;  %v4334_v32 = vld [vmem:[%s4163_s17 + $0xd0] sm:$0xff]  ;;  %v4341_v33 = vld [vmem:[%s4163_s17 + $0xd8] sm:$0xff]  ;;  %p3785_p3 = por %p3784_p1, %p3783_p4 }
  0xdc   : > { %3247 = vmatprep.mubr.msk.f32.mxu0 %vm414_vm1, %v4214_v7  ;;  %v1260_v34 = vld [vmem:[#allocation15] sm:$0xf]  ;;  %v4347_v35 = vld [vmem:[#allocation11] ss:$0 sm:$0xff] }
  0xdd   : > { %3336 = vmatprep.subr.msk.mxu0 %vm511_vm0, %v1260_v34  ;;  %p3786_p8 = pnand %p3785_p3, %p3779_p7 }
  0xde   : > { %3337 = vmatpush3.msk.msra.mxu0 %vm511_vm0, %v1260_v34 }
  0xdf   : > { %3248 = vmatmul.mubr.msk.f32.gmra.mrb[6].mxu0 %vm414_vm1, %v4234_v12 }
  0xe0   : > { %3250 = vmatprep.mubr.msk.f32.mxu0 %vm414_vm1, %v4242_v14 }
  0xe3   : > { %3251 = vmatmul.mubr.msk.f32.gmra.mrb[8].mxu0 %vm414_vm1, %v4251_v15 }
  0xe4   : > { %3253 = vmatprep.mubr.msk.f32.mxu0 %vm414_vm1, %v4254_v16 }
  0xe7   : > { %3254 = vmatmul.mubr.msk.f32.gmra.mrb[10].mxu0 %vm414_vm1, %v4261_v17 }
  0xe8   : > { %3256 = vmatprep.mubr.msk.f32.mxu0 %vm414_vm1, %v4264_v18 }
  0xeb   : > { %3257 = vmatmul.mubr.msk.f32.gmra.mrb[12].mxu0 %vm414_vm1, %v4271_v19 }
  0xec   : > { %3259 = vmatprep.mubr.msk.f32.mxu0 %vm414_vm1, %v4274_v20 }
  0xef   : > { %3260 = vmatmul.mubr.msk.f32.gmra.mrb[14].mxu0 %vm414_vm1, %v4281_v21 }
  0xf0   : > { %3262 = vmatprep.mubr.msk.f32.mxu0 %vm414_vm1, %v4284_v22 }
  0xf3   : > { %3263 = vmatmul.mubr.msk.f32.gmra.mrb[16].mxu0 %vm414_vm1, %v4291_v23 }
  0xf4   : > { %3265 = vmatprep.mubr.msk.f32.mxu0 %vm414_vm1, %v4294_v24 }
  0xf7   : > { %3266 = vmatmul.mubr.msk.f32.gmra.mrb[18].mxu0 %vm414_vm1, %v4301_v25 }
  0xf8   : > { %3268 = vmatprep.mubr.msk.f32.mxu0 %vm414_vm1, %v4304_v26 }
  0xfb   : > { %3269 = vmatmul.mubr.msk.f32.gmra.mrb[20].mxu0 %vm414_vm1, %v4311_v27 }
  0xfc   : > { %3271 = vmatprep.mubr.msk.f32.mxu0 %vm414_vm1, %v4314_v28 }
  0xff   : > { %3272 = vmatmul.mubr.msk.f32.gmra.mrb[22].mxu0 %vm414_vm1, %v4321_v29 }
 0x100   : > { %3274 = vmatprep.mubr.msk.f32.mxu0 %vm414_vm1, %v4324_v30 }
 0x103   : > { %3275 = vmatmul.mubr.msk.f32.gmra.mrb[24].mxu0 %vm414_vm1, %v4331_v31 }
 0x104   : > { %3277 = vmatprep.mubr.msk.f32.mxu0 %vm414_vm1, %v4334_v32 }
 0x107   : > { %3278 = vmatmul.mubr.msk.f32.gmra.mrb[26].mxu0 %vm414_vm1, %v4341_v33 }
 0x1a6   : > { %v3240_v36 = vpop.f32.mrb[0].mxu0 }
 0x1a7   : > { %v587_v37 = vadd.f32 %v3240_v36, %v4347_v35  ;;  %v581_v38 = vpop.f32.mrb[1].mxu0 }
 0x1a8   : > { %v582_v39 = vadd.f32 %v4347_v35, %v581_v38  ;;  %v4355_v48 = vpop.f32.mrb[0].mxu1 }
 0x1a9   : > { %v741_v42 = vmax.f32 %v587_v37, 0.0  ;;  %v4358_v52 = vpop.f32.mrb[1].mxu1 }
 0x1aa   : > { %v740_v40 = vmax.f32 %v582_v39, 0.0  ;;  %v3243_v41 = vpop.f32.mrb[2].mxu0 }
 0x1ab   : > { %v597_v43 = vadd.f32 %v3243_v41, %v4347_v35  ;;  %v591_v44 = vpop.f32.mrb[3].mxu0 }
 0x1ac   : > { %v592_v45 = vadd.f32 %v4347_v35, %v591_v44  ;;  %3288 = vmatprep.mubr.msk.f32.mxu1 %vm780_vm2, %v740_v40  ;;  %v4363_v56 = vpop.f32.mrb[2].mxu1 }
 0x1ad   : > { %3289 = vmatmul.mubr.msk.f32.vlgmr.msra.gmra.mrb[4].mxu1 %vm780_vm2, %v741_v42  ;;  %v743_v49 = vmax.f32 %v597_v43, 0.0  ;;  %v4366_v60 = vpop.f32.mrb[3].mxu1 }
 0x1ae   : > { %v742_v46 = vmax.f32 %v592_v45, 0.0  ;;  %v3246_v47 = vpop.f32.mrb[4].mxu0 }
 0x1af   : > { %v607_v50 = vadd.f32 %v3246_v47, %v4347_v35  ;;  %v601_v51 = vpop.f32.mrb[5].mxu0 }
 0x1b0   : > { %v602_v53 = vadd.f32 %v4347_v35, %v601_v51  ;;  %3291 = vmatprep.mubr.msk.f32.mxu1 %vm780_vm2, %v742_v46 }
 0x1b1   : > { %3292 = vmatmul.mubr.msk.f32.gmra.mrb[6].mxu1 %vm780_vm2, %v743_v49  ;;  %v745_v57 = vmax.f32 %v607_v50, 0.0 }
 0x1b2   : > { %v744_v54 = vmax.f32 %v602_v53, 0.0  ;;  %v3249_v55 = vpop.f32.mrb[6].mxu0 }
 0x1b3   : > { %v617_v58 = vadd.f32 %v3249_v55, %v4347_v35  ;;  %v611_v59 = vpop.f32.mrb[7].mxu0 }
 0x1b4   : > { %v612_v61 = vadd.f32 %v4347_v35, %v611_v59  ;;  %3294 = vmatprep.mubr.msk.f32.mxu1 %vm780_vm2, %v744_v54 }
 0x1b5   : > { %3295 = vmatmul.mubr.msk.f32.gmra.mrb[8].mxu1 %vm780_vm2, %v745_v57  ;;  %v747_v0 = vmax.f32 %v617_v58, 0.0 }
 0x1b6   : > { %v746_v62 = vmax.f32 %v612_v61, 0.0  ;;  %v3252_v63 = vpop.f32.mrb[8].mxu0 }
 0x1b7   : > { %v627_v11 = vadd.f32 %v3252_v63, %v4347_v35  ;;  %v621_v34 = vpop.f32.mrb[9].mxu0 }
 0x1b8   : > { %v622_v36 = vadd.f32 %v4347_v35, %v621_v34  ;;  %3297 = vmatprep.mubr.msk.f32.mxu1 %vm780_vm2, %v746_v62 }
 0x1b9   : > { %3298 = vmatmul.mubr.msk.f32.gmra.mrb[10].mxu1 %vm780_vm2, %v747_v0  ;;  %v749_v39 = vmax.f32 %v627_v11, 0.0 }
 0x1ba   : > { %v748_v37 = vmax.f32 %v622_v36, 0.0  ;;  %v3255_v38 = vpop.f32.mrb[10].mxu0 }
 0x1bb   : > { %v637_v40 = vadd.f32 %v3255_v38, %v4347_v35  ;;  %v631_v41 = vpop.f32.mrb[11].mxu0 }
 0x1bc   : > { %v632_v42 = vadd.f32 %v4347_v35, %v631_v41  ;;  %3300 = vmatprep.mubr.msk.f32.mxu1 %vm780_vm2, %v748_v37 }
 0x1bd   : > { %3301 = vmatmul.mubr.msk.f32.gmra.mrb[12].mxu1 %vm780_vm2, %v749_v39  ;;  %v751_v45 = vmax.f32 %v637_v40, 0.0 }
 0x1be   : > { %v750_v43 = vmax.f32 %v632_v42, 0.0  ;;  %v3258_v44 = vpop.f32.mrb[12].mxu0 }
 0x1bf   : > { %v647_v46 = vadd.f32 %v3258_v44, %v4347_v35  ;;  %v641_v47 = vpop.f32.mrb[13].mxu0 }
 0x1c0   : > { %v642_v49 = vadd.f32 %v4347_v35, %v641_v47  ;;  %3303 = vmatprep.mubr.msk.f32.mxu1 %vm780_vm2, %v750_v43 }
 0x1c1   : > { %3304 = vmatmul.mubr.msk.f32.gmra.mrb[14].mxu1 %vm780_vm2, %v751_v45  ;;  %v753_v53 = vmax.f32 %v647_v46, 0.0 }
 0x1c2   : > { %v752_v50 = vmax.f32 %v642_v49, 0.0  ;;  %v3261_v51 = vpop.f32.mrb[14].mxu0 }
 0x1c3   : > { %v657_v54 = vadd.f32 %v3261_v51, %v4347_v35  ;;  %v651_v55 = vpop.f32.mrb[15].mxu0 }
 0x1c4   : > { %v652_v57 = vadd.f32 %v4347_v35, %v651_v55  ;;  %3306 = vmatprep.mubr.msk.f32.mxu1 %vm780_vm2, %v752_v50 }
 0x1c5   : > { %3307 = vmatmul.mubr.msk.f32.gmra.mrb[16].mxu1 %vm780_vm2, %v753_v53  ;;  %v755_v61 = vmax.f32 %v657_v54, 0.0 }
 0x1c6   : > { %v754_v58 = vmax.f32 %v652_v57, 0.0  ;;  %v3264_v59 = vpop.f32.mrb[16].mxu0 }
 0x1c7   : > { %v667_v62 = vadd.f32 %v3264_v59, %v4347_v35  ;;  %v661_v63 = vpop.f32.mrb[17].mxu0 }
 0x1c8   : > { %v662_v0 = vadd.f32 %v4347_v35, %v661_v63  ;;  %3309 = vmatprep.mubr.msk.f32.mxu1 %vm780_vm2, %v754_v58 }
 0x1c9   : > { %3310 = vmatmul.mubr.msk.f32.gmra.mrb[18].mxu1 %vm780_vm2, %v755_v61  ;;  %v757_v36 = vmax.f32 %v667_v62, 0.0 }
 0x1ca   : > { %v756_v11 = vmax.f32 %v662_v0, 0.0  ;;  %v3267_v34 = vpop.f32.mrb[18].mxu0  ;;  %v722_v0 = vadd.f32 %v4347_v35, %v4358_v52 }
 0x1cb   : > { %v677_v37 = vadd.f32 %v3267_v34, %v4347_v35  ;;  %v671_v38 = vpop.f32.mrb[19].mxu0 }
 0x1cc   : > { %v672_v39 = vadd.f32 %v4347_v35, %v671_v38  ;;  %3312 = vmatprep.mubr.msk.f32.mxu1 %vm780_vm2, %v756_v11  ;;  %v727_v38 = vadd.f32 %v4355_v48, %v4347_v35 }
 0x1cd   : > { %3313 = vmatmul.mubr.msk.f32.gmra.mrb[20].mxu1 %vm780_vm2, %v757_v36  ;;  %v759_v42 = vmax.f32 %v677_v37, 0.0 }
 0x1ce   : > { %v758_v40 = vmax.f32 %v672_v39, 0.0  ;;  %v3270_v41 = vpop.f32.mrb[20].mxu0  ;;  %v769_v52 = vmax.f32 %v727_v38, 0.0 }
 0x1cf   : > { %v687_v43 = vadd.f32 %v3270_v41, %v4347_v35  ;;  %v681_v44 = vpop.f32.mrb[21].mxu0  ;;  %v732_v41 = vadd.f32 %v4347_v35, %v4366_v60  ;;  %v3867_v60 = vmov 0.0  }
 0x1d0   : > { %v682_v45 = vadd.f32 %v4347_v35, %v681_v44  ;;  %3315 = vmatprep.mubr.msk.f32.mxu1 %vm780_vm2, %v758_v40  ;;  %v768_v40 = vmax.f32 %v722_v0, 0.0  ;;  %1194 = vst.msk [vmem:[#allocation5] sm:$0xff] %vm414_vm1, %v3867_v60  ;;  %1166 = vst.msk [vmem:[#allocation3] sm:$0xff] %vm414_vm1, %v3867_v60 }
 0x1d1   : > { %3316 = vmatmul.mubr.msk.f32.gmra.mrb[22].mxu1 %vm780_vm2, %v759_v42  ;;  %v761_v49 = vmax.f32 %v687_v43, 0.0  ;;  %v737_v43 = vadd.f32 %v4363_v56, %v4347_v35  ;;  %v770_v44 = vmax.f32 %v732_v41, 0.0  ;;  %1195 = vst.msk [vmem:[#allocation5 + $0x8] sm:$0x1] %vm1167_vm3, %v3867_v60  ;;  %1168 = vst.msk [vmem:[#allocation3 + $0x8] sm:$0x1] %vm1167_vm3, %v3867_v60 }
 0x1d2   : > { %v760_v46 = vmax.f32 %v682_v45, 0.0  ;;  %v3273_v47 = vpop.f32.mrb[22].mxu0  ;;  %1169 = vst.msk [vmem:[#allocation3 + $0x10] sm:$0xff] %vm414_vm1, %v3867_v60  ;;  %1171 = vst.msk [vmem:[#allocation3 + $0x20] sm:$0xff] %vm414_vm1, %v3867_v60 }
 0x1d3   : > { %v697_v50 = vadd.f32 %v3273_v47, %v4347_v35  ;;  %v691_v51 = vpop.f32.mrb[23].mxu0  ;;  %v771_v48 = vmax.f32 %v737_v43, 0.0  ;;  %1170 = vst.msk [vmem:[#allocation3 + $0x18] sm:$0x1] %vm1167_vm3, %v3867_v60  ;;  %1172 = vst.msk [vmem:[#allocation3 + $0x28] sm:$0x1] %vm1167_vm3, %v3867_v60 }
 0x1d4   : > { %v692_v53 = vadd.f32 %v4347_v35, %v691_v51  ;;  %3318 = vmatprep.mubr.msk.f32.mxu1 %vm780_vm2, %v760_v46  ;;  %1173 = vst.msk [vmem:[#allocation3 + $0x30] sm:$0xff] %vm414_vm1, %v3867_v60  ;;  %1175 = vst.msk [vmem:[#allocation3 + $0x40] sm:$0xff] %vm414_vm1, %v3867_v60  ;;  %v1592_v46 = vld [vmem:[#allocation15 + $0x8] sm:$0xf]  ;;  %v1758_v47 = vld [vmem:[#allocation15 + $0xc] sm:$0xf] }
 0x1d5   : > { %3319 = vmatmul.mubr.msk.f32.gmra.mrb[24].mxu1 %vm780_vm2, %v761_v49  ;;  %v763_v57 = vmax.f32 %v697_v50, 0.0  ;;  %1174 = vst.msk [vmem:[#allocation3 + $0x38] sm:$0x1] %vm1167_vm3, %v3867_v60  ;;  %1176 = vst.msk [vmem:[#allocation3 + $0x48] sm:$0x1] %vm1167_vm3, %v3867_v60  ;;  %3364 = vmatprep.subr.msk.mxu0 %vm511_vm0, %v1592_v46 }
 0x1d6   : > { %v762_v54 = vmax.f32 %v692_v53, 0.0  ;;  %v3276_v55 = vpop.f32.mrb[24].mxu0  ;;  %1177 = vst.msk [vmem:[#allocation3 + $0x50] sm:$0xff] %vm414_vm1, %v3867_v60  ;;  %1179 = vst.msk [vmem:[#allocation3 + $0x60] sm:$0xff] %vm414_vm1, %v3867_v60  ;;  %v4482_v49 = vld [vmem:[#allocation14] ss:$0 sm:$0xff] }
 0x1d7   : > { %v707_v58 = vadd.f32 %v3276_v55, %v4347_v35  ;;  %v701_v59 = vpop.f32.mrb[25].mxu0  ;;  %1178 = vst.msk [vmem:[#allocation3 + $0x58] sm:$0x1] %vm1167_vm3, %v3867_v60  ;;  %1180 = vst.msk [vmem:[#allocation3 + $0x68] sm:$0x1] %vm1167_vm3, %v3867_v60  ;;  %v1244_v56 = vld [vmem:[#allocation3] sm:$0xff] }
 0x1d8   : > { %v702_v61 = vadd.f32 %v4347_v35, %v701_v59  ;;  %3321 = vmatprep.mubr.msk.f32.mxu1 %vm780_vm2, %v762_v54  ;;  %1181 = vst.msk [vmem:[#allocation3 + $0x70] sm:$0xff] %vm414_vm1, %v3867_v60  ;;  %1183 = vst.msk [vmem:[#allocation3 + $0x80] sm:$0xff] %vm414_vm1, %v3867_v60  ;;  %3338 = vmatprep.mubr.msk.f32.mxu0 %vm414_vm1, %v1244_v56 }
 0x1d9   : > { %3322 = vmatmul.mubr.msk.f32.gmra.mrb[26].mxu1 %vm780_vm2, %v763_v57  ;;  %v765_v11 = vmax.f32 %v707_v58, 0.0  ;;  %1182 = vst.msk [vmem:[#allocation3 + $0x78] sm:$0x1] %vm1167_vm3, %v3867_v60  ;;  %1184 = vst.msk [vmem:[#allocation3 + $0x88] sm:$0x1] %vm1167_vm3, %v3867_v60 }
 0x1da   : > { %v764_v62 = vmax.f32 %v702_v61, 0.0  ;;  %v3279_v63 = vpop.f32.mrb[26].mxu0  ;;  %1185 = vst.msk [vmem:[#allocation4] sm:$0xff] %vm414_vm1, %v3867_v60  ;;  %1186 = vst.msk [vmem:[#allocation4 + $0x8] sm:$0xff] %vm414_vm1, %v3867_v60 }
 0x1db   : > { %v717_v34 = vadd.f32 %v3279_v63, %v4347_v35  ;;  %v711_v36 = vpop.f32.mrb[27].mxu0  ;;  %1187 = vst.msk [vmem:[#allocation4 + $0x10] sm:$0xff] %vm414_vm1, %v3867_v60  ;;  %1188 = vst.msk [vmem:[#allocation4 + $0x18] sm:$0xff] %vm414_vm1, %v3867_v60 }
 0x1dc   : > { %v712_v37 = vadd.f32 %v4347_v35, %v711_v36  ;;  %3324 = vmatprep.mubr.msk.f32.mxu1 %vm780_vm2, %v764_v62  ;;  %1189 = vst.msk [vmem:[#allocation4 + $0x20] sm:$0xff] %vm414_vm1, %v3867_v60  ;;  %1190 = vst.msk [vmem:[#allocation4 + $0x28] sm:$0xff] %vm414_vm1, %v3867_v60  ;;  %v1426_v35 = vld [vmem:[#allocation15 + $0x4] sm:$0xf] }
 0x1dd   : > { %3325 = vmatmul.mubr.msk.f32.gmra.mrb[28].mxu1 %vm780_vm2, %v765_v11  ;;  %v767_v42 = vmax.f32 %v717_v34, 0.0  ;;  %1191 = vst.msk [vmem:[#allocation4 + $0x30] sm:$0xff] %vm414_vm1, %v3867_v60  ;;  %1192 = vst.msk [vmem:[#allocation4 + $0x38] sm:$0xff] %vm414_vm1, %v3867_v60  ;;  %3350 = vmatprep.subr.msk.mxu1 %vm511_vm0, %v1426_v35 }
 0x1de   : > { %v766_v39 = vmax.f32 %v712_v37, 0.0  ;;  %1193 = vst.msk [vmem:[#allocation4 + $0x40] sm:$0xff] %vm414_vm1, %v3867_v60  ;;  %1196 = vst.msk [vmem:[#allocation5 + $0x10] sm:$0xff] %vm414_vm1, %v3867_v60  ;;  %3351 = vmatpush3.msk.msra.mxu1 %vm511_vm0, %v1426_v35 }
 0x1df   : > { %1197 = vst.msk [vmem:[#allocation5 + $0x18] sm:$0x1] %vm1167_vm3, %v3867_v60  ;;  %1199 = vst.msk [vmem:[#allocation5 + $0x28] sm:$0x1] %vm1167_vm3, %v3867_v60  ;;  %3378 = vmatprep.subr.msk.mxu1 %vm511_vm0, %v1758_v47 }
 0x1e0   : > { %3327 = vmatprep.mubr.msk.f32.mxu1 %vm780_vm2, %v766_v39  ;;  %1198 = vst.msk [vmem:[#allocation5 + $0x20] sm:$0xff] %vm414_vm1, %v3867_v60  ;;  %1200 = vst.msk [vmem:[#allocation5 + $0x30] sm:$0xff] %vm414_vm1, %v3867_v60 }
 0x1e1   : > { %3328 = vmatmul.mubr.msk.f32.gmra.mrb[30].mxu1 %vm780_vm2, %v767_v42  ;;  %1201 = vst.msk [vmem:[#allocation5 + $0x38] sm:$0x1] %vm1167_vm3, %v3867_v60  ;;  %1203 = vst.msk [vmem:[#allocation5 + $0x48] sm:$0x1] %vm1167_vm3, %v3867_v60  ;;  %v1409_v45 = vld [vmem:[#allocation4] sm:$0xff] }
 0x1e2   : > { %3330 = vmatprep.mubr.msk.f32.mxu1 %vm780_vm2, %v768_v40  ;;  %1202 = vst.msk [vmem:[#allocation5 + $0x40] sm:$0xff] %vm414_vm1, %v3867_v60  ;;  %1204 = vst.msk [vmem:[#allocation5 + $0x50] sm:$0xff] %vm414_vm1, %v3867_v60 }
 0x1e3   : > { %1205 = vst.msk [vmem:[#allocation5 + $0x58] sm:$0x1] %vm1167_vm3, %v3867_v60  ;;  %1207 = vst.msk [vmem:[#allocation5 + $0x68] sm:$0x1] %vm1167_vm3, %v3867_v60 }
 0x1e4   : > { %1206 = vst.msk [vmem:[#allocation5 + $0x60] sm:$0xff] %vm414_vm1, %v3867_v60  ;;  %1208 = vst.msk [vmem:[#allocation5 + $0x70] sm:$0xff] %vm414_vm1, %v3867_v60 }
 0x1e5   : > { %3331 = vmatmul.mubr.msk.f32.gmra.mrb[32].mxu1 %vm780_vm2, %v769_v52  ;;  %1209 = vst.msk [vmem:[#allocation5 + $0x78] sm:$0x1] %vm1167_vm3, %v3867_v60 }
 0x1e6   : > { %3333 = vmatprep.mubr.msk.f32.mxu1 %vm780_vm2, %v770_v44  ;;  %1236 = vst.msk [vmem:[#allocation2] sm:$0xff] %vm780_vm2, %v3867_v60  ;;  %1237 = vst.msk [vmem:[#allocation2 + $0x8] sm:$0xff] %vm780_vm2, %v3867_v60 }
 0x1e7   : > { %1238 = vst.msk [vmem:[#allocation2 + $0x10] sm:$0xff] %vm780_vm2, %v3867_v60  ;;  %1239 = vst.msk [vmem:[#allocation2 + $0x18] sm:$0xff] %vm780_vm2, %v3867_v60 }
 0x1e8   : > { %1240 = vst.msk [vmem:[#allocation2 + $0x20] sm:$0xff] %vm780_vm2, %v3867_v60  ;;  %1241 = vst.msk [vmem:[#allocation2 + $0x28] sm:$0xff] %vm780_vm2, %v3867_v60 }
 0x1e9   : > { %3334 = vmatmul.mubr.msk.f32.gmra.mrb[34].mxu1 %vm780_vm2, %v771_v48  ;;  %1242 = vst.msk [vmem:[#allocation2 + $0x30] sm:$0xff] %vm780_vm2, %v3867_v60  ;;  %1243 = vst.msk [vmem:[#allocation2 + $0x38] sm:$0xff] %vm780_vm2, %v3867_v60 }
 0x1ea   : > { %3352 = vmatprep.mubr.msk.f32.mxu1 %vm414_vm1, %v1409_v45 }
 0x280   : > { %v3290_v50 = vpop.f32.mrb[4].mxu1 }
 0x281   : > { %v949_v51 = vadd.f32 %v3290_v50, %v4482_v49  ;;  %v943_v53 = vpop.f32.mrb[5].mxu1  ;;  %v4512_v50 = vld [vmem:[#allocation15 + $0x10] sm:$0xf] }
 0x282   : > { %v4486_v54 = vadd.f32 %v4482_v49, %v943_v53 }
 0x283   : > { %v1103_v55 = vmax.f32 %v949_v51, 0.0 }
 0x284   : > { %v3293_v57 = vpop.f32.mrb[6].mxu1 }
 0x285   : > { %v1135_v58 = vadd.f32 %v1103_v55, %v4185_v2  ;;  %v959_v59 = vadd.f32 %v3293_v57, %v4482_v49  ;;  %v953_v61 = vpop.f32.mrb[7].mxu1 }
 0x286   : > { %v954_v62 = vadd.f32 %v4482_v49, %v953_v61 }
 0x287   : > { %1228 = vst.msk [vmem:[#allocation5 + $0x1] sm:$0xff] %vm414_vm1, %v1135_v58  ;;  %v1105_v63 = vmax.f32 %v959_v59, 0.0 }
 0x288   : > { %v1104_v0 = vmax.f32 %v954_v62, 0.0  ;;  %v3296_v11 = vpop.f32.mrb[8].mxu1 }
 0x289   : > { %v1137_v34 = vadd.f32 %v1105_v63, %v4201_v4  ;;  %v969_v36 = vadd.f32 %v3296_v11, %v4482_v49  ;;  %v963_v37 = vpop.f32.mrb[9].mxu1 }
 0x28a   : > { %v1136_v38 = vadd.f32 %v1104_v0, %v4191_v3  ;;  %v4496_v39 = vadd.f32 %v4482_v49, %v963_v37 }
 0x28b   : > { %1211 = vst.msk [vmem:[#allocation3 + $0x11] sm:$0xff] %vm414_vm1, %v1137_v34  ;;  %v1107_v2 = vmax.f32 %v969_v36, 0.0 }
 0x28c   : > { %1220 = vst.msk [vmem:[#allocation4 + $0x8] sm:$0xff] %vm414_vm1, %v1136_v38  ;;  %v3299_v40 = vpop.f32.mrb[10].mxu1 }
 0x28d   : > { %v1139_v41 = vadd.f32 %v1107_v2, %v4211_v6  ;;  %v979_v42 = vadd.f32 %v3299_v40, %v4482_v49  ;;  %v973_v52 = vpop.f32.mrb[11].mxu1 }
 0x28e   : > { %v974_v4 = vadd.f32 %v4482_v49, %v973_v52 }
 0x28f   : > { %1229 = vst.msk [vmem:[#allocation5 + $0x11] sm:$0xff] %vm414_vm1, %v1139_v41  ;;  %v1109_v43 = vmax.f32 %v979_v42, 0.0 }
 0x290   : > { %v1108_v3 = vmax.f32 %v974_v4, 0.0  ;;  %v3302_v44 = vpop.f32.mrb[12].mxu1 }
 0x291   : > { %v1141_v48 = vadd.f32 %v1109_v43, %v4234_v12  ;;  %v989_v60 = vadd.f32 %v3302_v44, %v4482_v49  ;;  %v983_v35 = vpop.f32.mrb[13].mxu1  ;;  %v4519_v12 = vld [vmem:[#allocation15 + $0x14] sm:$0xf] }
 0x292   : > { %v1140_v56 = vadd.f32 %v1108_v3, %v4214_v7  ;;  %v4508_v45 = vadd.f32 %v4482_v49, %v983_v35  ;;  %v4510_v6 = vld [vmem:[#allocation3 + $0x10] sm:$0xff] }
 0x293   : > { %1212 = vst.msk [vmem:[#allocation3 + $0x21] sm:$0xff] %vm414_vm1, %v1141_v48  ;;  %v1111_v51 = vmax.f32 %v989_v60, 0.0  ;;  %3339 = vmatmul.mubr.msk.f32.vlgmr.msra.gmra.mrb[28].mxu0 %vm414_vm1, %v4510_v6  ;;  %v4517_v53 = vld [vmem:[#allocation4 + $0x8] sm:$0xff] }
 0x294   : > { %1221 = vst.msk [vmem:[#allocation4 + $0x10] sm:$0xff] %vm414_vm1, %v1140_v56  ;;  %v3305_v7 = vpop.f32.mrb[14].mxu1  ;;  %3353 = vmatmul.mubr.msk.f32.vlgmr.msra.gmra.mrb[36].mxu1 %vm414_vm1, %v4517_v53  ;;  %3365 = vmatpush3.msk.msra.mxu0 %vm511_vm0, %v1592_v46 }
 0x295   : > { %v1143_v55 = vadd.f32 %v1111_v51, %v4251_v15  ;;  %v999_v57 = vadd.f32 %v3305_v7, %v4482_v49  ;;  %v993_v58 = vpop.f32.mrb[15].mxu1  ;;  %3379 = vmatpush3.msk.msra.mxu1 %vm511_vm0, %v1758_v47  ;;  %3392 = vmatprep.subr.msk.mxu0 %vm511_vm0, %v4512_v50 }
 0x296   : > { %v994_v59 = vadd.f32 %v4482_v49, %v993_v58  ;;  %3406 = vmatprep.subr.msk.mxu1 %vm511_vm0, %v4519_v12 }
 0x297   : > { %1230 = vst.msk [vmem:[#allocation5 + $0x21] sm:$0xff] %vm414_vm1, %v1143_v55  ;;  %v1113_v61 = vmax.f32 %v999_v57, 0.0 }
 0x298   : > { %v1112_v62 = vmax.f32 %v994_v59, 0.0  ;;  %v3308_v46 = vpop.f32.mrb[16].mxu1 }
 0x299   : > { %v1145_v15 = vadd.f32 %v1113_v61, %v4261_v17  ;;  %v1009_v63 = vadd.f32 %v3308_v46, %v4482_v49  ;;  %v1003_v0 = vpop.f32.mrb[17].mxu1 }
 0x29a   : > { %v1144_v47 = vadd.f32 %v1112_v62, %v4254_v16  ;;  %v4538_v11 = vadd.f32 %v4482_v49, %v1003_v0  ;;  %v4540_v34 = vld [vmem:[#allocation3 + $0x20] sm:$0xff] }
 0x29b   : > { %1213 = vst.msk [vmem:[#allocation3 + $0x31] sm:$0xff] %vm414_vm1, %v1145_v15  ;;  %v1115_v36 = vmax.f32 %v1009_v63, 0.0  ;;  %3341 = vmatprep.mubr.msk.f32.mxu0 %vm414_vm1, %v4540_v34  ;;  %v4545_v37 = vld [vmem:[#allocation4 + $0x10] sm:$0xff] }
 0x29c   : > { %1222 = vst.msk [vmem:[#allocation4 + $0x18] sm:$0xff] %vm414_vm1, %v1144_v47  ;;  %v3311_v17 = vpop.f32.mrb[18].mxu1  ;;  %3355 = vmatprep.mubr.msk.f32.mxu1 %vm414_vm1, %v4545_v37 }
 0x29d   : > { %v1147_v16 = vadd.f32 %v1115_v36, %v4271_v19  ;;  %v1019_v38 = vadd.f32 %v3311_v17, %v4482_v49  ;;  %v1013_v2 = vpop.f32.mrb[19].mxu1 }
 0x29e   : > { %v1014_v40 = vadd.f32 %v4482_v49, %v1013_v2 }
 0x29f   : > { %1231 = vst.msk [vmem:[#allocation5 + $0x31] sm:$0xff] %vm414_vm1, %v1147_v16  ;;  %v1117_v41 = vmax.f32 %v1019_v38, 0.0 }
 0x2a0   : > { %v1116_v42 = vmax.f32 %v1014_v40, 0.0  ;;  %v3314_v52 = vpop.f32.mrb[20].mxu1 }
 0x2a1   : > { %v1149_v4 = vadd.f32 %v1117_v41, %v4281_v21  ;;  %v1029_v43 = vadd.f32 %v3314_v52, %v4482_v49  ;;  %v1023_v3 = vpop.f32.mrb[21].mxu1 }
 0x2a2   : > { %v1148_v44 = vadd.f32 %v1116_v42, %v4274_v20  ;;  %v4558_v48 = vadd.f32 %v4482_v49, %v1023_v3  ;;  %v4560_v19 = vld [vmem:[#allocation3 + $0x30] sm:$0xff] }
 0x2a3   : > { %1214 = vst.msk [vmem:[#allocation3 + $0x41] sm:$0xff] %vm414_vm1, %v1149_v4  ;;  %v1119_v60 = vmax.f32 %v1029_v43, 0.0  ;;  %3342 = vmatmul.mubr.msk.f32.gmra.mrb[30].mxu0 %vm414_vm1, %v4560_v19  ;;  %v4565_v35 = vld [vmem:[#allocation4 + $0x18] sm:$0xff] }
 0x2a4   : > { %1223 = vst.msk [vmem:[#allocation4 + $0x20] sm:$0xff] %vm414_vm1, %v1148_v44  ;;  %v3317_v21 = vpop.f32.mrb[22].mxu1  ;;  %3356 = vmatmul.mubr.msk.f32.gmra.mrb[38].mxu1 %vm414_vm1, %v4565_v35 }
 0x2a5   : > { %v1151_v20 = vadd.f32 %v1119_v60, %v4291_v23  ;;  %v1039_v56 = vadd.f32 %v3317_v21, %v4482_v49  ;;  %v1033_v51 = vpop.f32.mrb[23].mxu1 }
 0x2a6   : > { %v1034_v7 = vadd.f32 %v4482_v49, %v1033_v51 }
 0x2a7   : > { %1232 = vst.msk [vmem:[#allocation5 + $0x41] sm:$0xff] %vm414_vm1, %v1151_v20  ;;  %v1121_v55 = vmax.f32 %v1039_v56, 0.0 }
 0x2a8   : > { %v1120_v57 = vmax.f32 %v1034_v7, 0.0  ;;  %v3320_v58 = vpop.f32.mrb[24].mxu1 }
 0x2a9   : > { %v1153_v59 = vadd.f32 %v1121_v55, %v4301_v25  ;;  %v1049_v61 = vadd.f32 %v3320_v58, %v4482_v49  ;;  %v1043_v62 = vpop.f32.mrb[25].mxu1 }
 0x2aa   : > { %v1152_v46 = vadd.f32 %v1120_v57, %v4294_v24  ;;  %v4578_v15 = vadd.f32 %v4482_v49, %v1043_v62  ;;  %v4580_v23 = vld [vmem:[#allocation3 + $0x40] sm:$0xff] }
 0x2ab   : > { %1215 = vst.msk [vmem:[#allocation3 + $0x51] sm:$0xff] %vm414_vm1, %v1153_v59  ;;  %v1123_v63 = vmax.f32 %v1049_v61, 0.0  ;;  %3344 = vmatprep.mubr.msk.f32.mxu0 %vm414_vm1, %v4580_v23  ;;  %v4585_v0 = vld [vmem:[#allocation4 + $0x20] sm:$0xff] }
 0x2ac   : > { %1224 = vst.msk [vmem:[#allocation4 + $0x28] sm:$0xff] %vm414_vm1, %v1152_v46  ;;  %v3323_v25 = vpop.f32.mrb[26].mxu1  ;;  %3358 = vmatprep.mubr.msk.f32.mxu1 %vm414_vm1, %v4585_v0 }
 0x2ad   : > { %v1155_v24 = vadd.f32 %v1123_v63, %v4311_v27  ;;  %v1059_v47 = vadd.f32 %v3323_v25, %v4482_v49  ;;  %v1053_v36 = vpop.f32.mrb[27].mxu1 }
 0x2ae   : > { %v1054_v17 = vadd.f32 %v4482_v49, %v1053_v36  ;;  %v1575_v36 = vld [vmem:[#allocation3 + $0x1] sm:$0xff] }
 0x2af   : > { %1233 = vst.msk [vmem:[#allocation5 + $0x51] sm:$0xff] %vm414_vm1, %v1155_v24  ;;  %v1125_v16 = vmax.f32 %v1059_v47, 0.0 }
 0x2b0   : > { %v1124_v38 = vmax.f32 %v1054_v17, 0.0  ;;  %v3326_v2 = vpop.f32.mrb[28].mxu1 }
 0x2b1   : > { %v1157_v40 = vadd.f32 %v1125_v16, %v4321_v29  ;;  %v1069_v41 = vadd.f32 %v3326_v2, %v4482_v49  ;;  %v1063_v42 = vpop.f32.mrb[29].mxu1  ;;  %v1742_v2 = vld [vmem:[#allocation5 + $0x10] sm:$0xff] }
 0x2b2   : > { %v1156_v52 = vadd.f32 %v1124_v38, %v4314_v28  ;;  %v4598_v4 = vadd.f32 %v4482_v49, %v1063_v42  ;;  %v4600_v27 = vld [vmem:[#allocation3 + $0x50] sm:$0xff]  ;;  %v2414_v42 = vld [vmem:[#allocation15 + $0x1c] sm:$0xf] }
 0x2b3   : > { %1216 = vst.msk [vmem:[#allocation3 + $0x61] sm:$0xff] %vm414_vm1, %v1157_v40  ;;  %v1127_v43 = vmax.f32 %v1069_v41, 0.0  ;;  %3345 = vmatmul.mubr.msk.f32.gmra.mrb[32].mxu0 %vm414_vm1, %v4600_v27  ;;  %v4605_v3 = vld [vmem:[#allocation4 + $0x28] sm:$0xff]  ;;  %v2248_v40 = vld [vmem:[#allocation15 + $0x18] sm:$0xf] }
 0x2b4   : > { %1225 = vst.msk [vmem:[#allocation4 + $0x30] sm:$0xff] %vm414_vm1, %v1156_v52  ;;  %v3329_v29 = vpop.f32.mrb[30].mxu1  ;;  %3359 = vmatmul.mubr.msk.f32.gmra.mrb[40].mxu1 %vm414_vm1, %v4605_v3  ;;  %v1743_v41 = vld [vmem:[#allocation5 + $0x20] sm:$0xff] }
 0x2b5   : > { %v1159_v28 = vadd.f32 %v1127_v43, %v4331_v31  ;;  %v1079_v44 = vadd.f32 %v3329_v29, %v4482_v49  ;;  %v1073_v60 = vpop.f32.mrb[31].mxu1  ;;  %v4660_v52 = vld [vmem:[#allocation3 + $0x31] sm:$0xff]  ;;  %v4667_v43 = vld [vmem:[#allocation3 + $0x41] sm:$0xff] }
 0x2b6   : > { %v1074_v21 = vadd.f32 %v4482_v49, %v1073_v60  ;;  %v1744_v29 = vld [vmem:[#allocation5 + $0x30] sm:$0xff] }
 0x2b7   : > { %1234 = vst.msk [vmem:[#allocation5 + $0x61] sm:$0xff] %vm414_vm1, %v1159_v28  ;;  %v1129_v20 = vmax.f32 %v1079_v44, 0.0  ;;  %v4675_v28 = vld [vmem:[#allocation3 + $0x51] sm:$0xff]  ;;  %v1746_v60 = vld [vmem:[#allocation5 + $0x50] sm:$0xff] }
 0x2b8   : > { %v1128_v56 = vmax.f32 %v1074_v21, 0.0  ;;  %v3332_v51 = vpop.f32.mrb[32].mxu1 }
 0x2b9   : > { %v1161_v7 = vadd.f32 %v1129_v20, %v4341_v33  ;;  %v1089_v55 = vadd.f32 %v3332_v51, %v4482_v49  ;;  %v1083_v57 = vpop.f32.mrb[33].mxu1  ;;  %v1106_v20 = vmax.f32 %v4496_v39, 0.0  ;;  %v1110_v51 = vmax.f32 %v4508_v45, 0.0 }
 0x2ba   : > { %v1160_v58 = vadd.f32 %v1128_v56, %v4334_v32  ;;  %v4617_v59 = vld [vmem:[#allocation3 + $0x60] sm:$0xff]  ;;  %v4620_v31 = vadd.f32 %v4482_v49, %v1083_v57  ;;  %v1114_v39 = vmax.f32 %v4538_v11, 0.0  ;;  %v1118_v45 = vmax.f32 %v4558_v48, 0.0  ;;  %v2068_v48 = vld [vmem:[#allocation5 + $0x31] sm:$0xff] }
 0x2bb   : > { %1217 = vst.msk [vmem:[#allocation3 + $0x71] sm:$0xff] %vm414_vm1, %v1161_v7  ;;  %3347 = vmatprep.mubr.msk.f32.mxu0 %vm414_vm1, %v4617_v59  ;;  %v4625_v61 = vld [vmem:[#allocation4 + $0x30] sm:$0xff]  ;;  %v1131_v62 = vmax.f32 %v1089_v55, 0.0  ;;  %v1138_v57 = vadd.f32 %v1106_v20, %v4204_v5  ;;  %v1122_v5 = vmax.f32 %v4578_v15, 0.0  ;;  %v1126_v11 = vmax.f32 %v4598_v4, 0.0  ;;  %v2070_v4 = vld [vmem:[#allocation5 + $0x51] sm:$0xff] }
 0x2bc   : > { %1226 = vst.msk [vmem:[#allocation4 + $0x38] sm:$0xff] %vm414_vm1, %v1160_v58  ;;  %3361 = vmatprep.mubr.msk.f32.mxu1 %vm414_vm1, %v4625_v61  ;;  %v3335_v33 = vpop.f32.mrb[34].mxu1  ;;  %v4679_v44 = vld [vmem:[#allocation3 + $0x61] sm:$0xff]  ;;  %v2065_v55 = vld [vmem:[#allocation5 + $0x1] sm:$0xff]  ;;  %v2066_v58 = vld [vmem:[#allocation5 + $0x11] sm:$0xff] }
 0x2bd   : > { %v1163_v32 = vadd.f32 %v1131_v62, %v4222_v9  ;;  %v1099_v46 = vadd.f32 %v3335_v33, %v4482_v49  ;;  %v1093_v63 = vpop.f32.mrb[35].mxu1  ;;  %v2580_v62 = vld [vmem:[#allocation15 + $0x20] sm:$0xf]  ;;  %v2067_v33 = vld [vmem:[#allocation5 + $0x21] sm:$0xff]  ;;  %v1154_v15 = vadd.f32 %v1122_v5, %v4304_v26 }
 0x2be   : > { %v1094_v25 = vadd.f32 %v4482_v49, %v1093_v63  ;;  %v1741_v49 = vld [vmem:[#allocation5] sm:$0xff] }
 0x2bf   : > { %1235 = vst.msk [vmem:[#allocation5 + $0x71] sm:$0xff] %vm414_vm1, %v1163_v32  ;;  %v1133_v24 = vmax.f32 %v1099_v46, 0.0  ;;  %v1747_v21 = vld [vmem:[#allocation5 + $0x60] sm:$0xff]  ;;  %v1146_v32 = vadd.f32 %v1114_v39, %v4264_v18  ;;  %v1130_v46 = vmax.f32 %v4620_v31, 0.0 }
 0x2c0   : > { %v1132_v47 = vmax.f32 %v1094_v25, 0.0  ;;  %v2069_v18 = vld [vmem:[#allocation5 + $0x41] sm:$0xff] }
 0x2c1   : > { %v1165_v17 = vadd.f32 %v1133_v24, %v4239_v13  ;;  %v4648_v13 = vld [vmem:[#allocation3 + $0x11] sm:$0xff]  ;;  %v2071_v63 = vld [vmem:[#allocation5 + $0x61] sm:$0xff]  ;;  %v1162_v25 = vadd.f32 %v1130_v46, %v4217_v8 }
 0x2c2   : > { %v4635_v16 = vld [vmem:[#allocation3 + $0x70] sm:$0xff]  ;;  %v1164_v38 = vadd.f32 %v1132_v47, %v4225_v10  ;;  %v4652_v10 = vld [vmem:[#allocation3 + $0x21] sm:$0xff]  ;;  %v1255_v24 = vld [vmem:[#allocation2 + $0x18] sm:$0xff] }
 0x2c3   : > { %3348 = vmatmul.mubr.msk.f32.gmra.mrb[34].mxu0 %vm414_vm1, %v4635_v16  ;;  %v4640_v9 = vld [vmem:[#allocation4 + $0x38] sm:$0xff]  ;;  %1218 = vst.msk [vmem:[#allocation3 + $0x81] sm:$0xff] %vm414_vm1, %v1165_v17  ;;  %v4688_v7 = vld [vmem:[#allocation3 + $0x71] sm:$0xff] }
 0x2c4   : > { %3362 = vmatmul.mubr.msk.f32.gmra.mrb[42].mxu1 %vm414_vm1, %v4640_v9  ;;  %3366 = vmatprep.mubr.msk.f32.mxu0 %vm414_vm1, %v1575_v36  ;;  %1227 = vst.msk [vmem:[#allocation4 + $0x40] sm:$0xff] %vm414_vm1, %v1164_v38  ;;  %v1254_v47 = vld [vmem:[#allocation2 + $0x10] sm:$0xff] }
 0x2c5   : > { %3380 = vmatprep.mubr.msk.f32.mxu1 %vm414_vm1, %v1741_v49 }
 0x2c6   : > { %v1748_v56 = vld [vmem:[#allocation5 + $0x70] sm:$0xff] }
 0x2c7   : > { %3367 = vmatmul.mubr.msk.f32.vlgmr.msra.gmra.mrb[36].mxu0 %vm414_vm1, %v4648_v13  ;;  %v2072_v26 = vld [vmem:[#allocation5 + $0x71] sm:$0xff] }
 0x2c8   : > { %3369 = vmatprep.mubr.msk.f32.mxu0 %vm414_vm1, %v4652_v10  ;;  %3381 = vmatmul.mubr.msk.f32.vlgmr.msra.gmra.mrb[44].mxu1 %vm414_vm1, %v1742_v2 }
 0x2c9   : > { %3383 = vmatprep.mubr.msk.f32.mxu1 %vm414_vm1, %v1743_v41  ;;  %3393 = vmatpush3.msk.msra.mxu0 %vm511_vm0, %v4512_v50  ;;  %v1745_v50 = vld [vmem:[#allocation5 + $0x40] sm:$0xff]  ;;  %v1257_v41 = vld [vmem:[#allocation2 + $0x28] sm:$0xff] }
 0x2ca   : > { %3407 = vmatpush3.msk.msra.mxu1 %vm511_vm0, %v4519_v12  ;;  %3420 = vmatprep.subr.msk.mxu0 %vm511_vm0, %v2248_v40  ;;  %v1102_v12 = vmax.f32 %v4486_v54, 0.0  ;;  %v2238_v8 = vld [vmem:[#allocation3 + $0x80] sm:$0xff] }
 0x2cb   : > { %3370 = vmatmul.mubr.msk.f32.gmra.mrb[38].mxu0 %vm414_vm1, %v4660_v52  ;;  %3434 = vmatprep.subr.msk.mxu1 %vm511_vm0, %v2414_v42 }
 0x2cc   : > { %3372 = vmatprep.mubr.msk.f32.mxu0 %vm414_vm1, %v4667_v43  ;;  %3384 = vmatmul.mubr.msk.f32.gmra.mrb[46].mxu1 %vm414_vm1, %v1744_v29  ;;  %v1134_v54 = vadd.f32 %v1102_v12, %v4182_v1  ;;  %v1142_v1 = vadd.f32 %v1110_v51, %v4242_v14  ;;  %v1150_v14 = vadd.f32 %v1118_v45, %v4284_v22 }
 0x2cd   : > { %3386 = vmatprep.mubr.msk.f32.mxu1 %vm414_vm1, %v1745_v50  ;;  %v1158_v22 = vadd.f32 %v1126_v11, %v4324_v30  ;;  %v2404_v30 = vld [vmem:[#allocation4 + $0x40] sm:$0xff] }
 0x2cf   : > { %3373 = vmatmul.mubr.msk.f32.gmra.mrb[40].mxu0 %vm414_vm1, %v4675_v28 }
 0x2d0   : > { %3375 = vmatprep.mubr.msk.f32.mxu0 %vm414_vm1, %v4679_v44  ;;  %3387 = vmatmul.mubr.msk.f32.gmra.mrb[48].mxu1 %vm414_vm1, %v1746_v60 }
 0x2d1   : > { %3389 = vmatprep.mubr.msk.f32.mxu1 %vm414_vm1, %v1747_v21 }
 0x2d3   : > { %3376 = vmatmul.mubr.msk.f32.gmra.mrb[42].mxu0 %vm414_vm1, %v4688_v7 }
 0x2d4   : > { %3390 = vmatmul.mubr.msk.f32.gmra.mrb[50].mxu1 %vm414_vm1, %v1748_v56  ;;  %3394 = vmatprep.mubr.msk.f32.mxu0 %vm414_vm1, %v1134_v54  ;;  %v1259_v56 = vld [vmem:[#allocation2 + $0x38] sm:$0xff]  ;;  %v1258_v54 = vld [vmem:[#allocation2 + $0x30] sm:$0xff] }
 0x2d5   : > { %3408 = vmatprep.mubr.msk.f32.mxu1 %vm414_vm1, %v2065_v55 }
 0x2d7   : > { %3395 = vmatmul.mubr.msk.f32.vlgmr.msra.gmra.mrb[44].mxu0 %vm414_vm1, %v1138_v57 }
 0x2d8   : > { %3397 = vmatprep.mubr.msk.f32.mxu0 %vm414_vm1, %v1142_v1  ;;  %3409 = vmatmul.mubr.msk.f32.vlgmr.msra.gmra.mrb[52].mxu1 %vm414_vm1, %v2066_v58 }
 0x2d9   : > { %3411 = vmatprep.mubr.msk.f32.mxu1 %vm414_vm1, %v2067_v33  ;;  %3421 = vmatpush3.msk.msra.mxu0 %vm511_vm0, %v2248_v40 }
 0x2da   : > { %3435 = vmatpush3.msk.msra.mxu1 %vm511_vm0, %v2414_v42  ;;  %3448 = vmatprep.subr.msk.mxu0 %vm511_vm0, %v2580_v62  ;;  %v1256_v42 = vld [vmem:[#allocation2 + $0x20] sm:$0xff] }
 0x2db   : > { %3398 = vmatmul.mubr.msk.f32.gmra.mrb[46].mxu0 %vm414_vm1, %v1146_v32 }
 0x2dc   : > { %3400 = vmatprep.mubr.msk.f32.mxu0 %vm414_vm1, %v1150_v14  ;;  %3412 = vmatmul.mubr.msk.f32.gmra.mrb[54].mxu1 %vm414_vm1, %v2068_v48 }
 0x2dd   : > { %3414 = vmatprep.mubr.msk.f32.mxu1 %vm414_vm1, %v2069_v18 }
 0x2df   : > { %3401 = vmatmul.mubr.msk.f32.gmra.mrb[48].mxu0 %vm414_vm1, %v1154_v15 }
 0x2e0   : > { %3403 = vmatprep.mubr.msk.f32.mxu0 %vm414_vm1, %v1158_v22  ;;  %3415 = vmatmul.mubr.msk.f32.gmra.mrb[56].mxu1 %vm414_vm1, %v2070_v4 }
 0x2e1   : > { %3417 = vmatprep.mubr.msk.f32.mxu1 %vm414_vm1, %v2071_v63 }
 0x2e3   : > { %3404 = vmatmul.mubr.msk.f32.gmra.mrb[50].mxu0 %vm414_vm1, %v1162_v25 }
 0x2e4   : > { %3418 = vmatmul.mubr.msk.f32.gmra.mrb[58].mxu1 %vm414_vm1, %v2072_v26  ;;  %3422 = vmatprep.mubr.msk.f32.mxu0 %vm414_vm1, %v4510_v6  ;;  %v2570_v6 = vld [vmem:[#allocation3 + $0x81] sm:$0xff] }
 0x2e5   : > { %3436 = vmatprep.mubr.msk.f32.mxu1 %vm414_vm1, %v4517_v53  ;;  %v1253_v53 = vld [vmem:[#allocation2 + $0x8] sm:$0xff] }
 0x2e7   : > { %3423 = vmatmul.mubr.msk.f32.vlgmr.msra.gmra.mrb[52].mxu0 %vm414_vm1, %v4540_v34  ;;  %v1252_v34 = vld [vmem:[#allocation2] sm:$0xff] }
 0x2e8   : > { %3425 = vmatprep.mubr.msk.f32.mxu0 %vm414_vm1, %v4560_v19  ;;  %3437 = vmatmul.mubr.msk.f32.vlgmr.msra.gmra.mrb[60].mxu1 %vm414_vm1, %v4545_v37 }
 0x2e9   : > { %3439 = vmatprep.mubr.msk.f32.mxu1 %vm414_vm1, %v4565_v35  ;;  %3449 = vmatpush3.msk.msra.mxu0 %vm511_vm0, %v2580_v62 }
 0x2eb   : > { %3426 = vmatmul.mubr.msk.f32.gmra.mrb[54].mxu0 %vm414_vm1, %v4580_v23 }
 0x2ec   : > { %3428 = vmatprep.mubr.msk.f32.mxu0 %vm414_vm1, %v4600_v27  ;;  %3440 = vmatmul.mubr.msk.f32.gmra.mrb[62].mxu1 %vm414_vm1, %v4585_v0 }
 0x2ed   : > { %3442 = vmatprep.mubr.msk.f32.mxu1 %vm414_vm1, %v4605_v3 }
 0x2ef   : > { %3429 = vmatmul.mubr.msk.f32.gmra.mrb[56].mxu0 %vm414_vm1, %v4617_v59 }
 0x2f0   : > { %3431 = vmatprep.mubr.msk.f32.mxu0 %vm414_vm1, %v4635_v16  ;;  %3443 = vmatmul.mubr.msk.f32.gmra.mrb[64].mxu1 %vm414_vm1, %v4625_v61 }
 0x2f1   : > { %3445 = vmatprep.mubr.msk.f32.mxu1 %vm414_vm1, %v4640_v9 }
 0x2f3   : > { %3432 = vmatmul.mubr.msk.f32.gmra.mrb[58].mxu0 %vm414_vm1, %v2238_v8 }
 0x2f4   : > { %3450 = vmatprep.mubr.msk.f32.mxu0 %vm414_vm1, %v4648_v13  ;;  %3446 = vmatmul.mubr.msk.f32.gmra.mrb[66].mxu1 %vm414_vm1, %v2404_v30 }
 0x2f7   : > { %3451 = vmatmul.mubr.msk.f32.vlgmr.msra.gmra.mrb[60].mxu0 %vm414_vm1, %v4652_v10 }
 0x2f8   : > { %3453 = vmatprep.mubr.msk.f32.mxu0 %vm414_vm1, %v4660_v52 }
 0x2fb   : > { %3454 = vmatmul.mubr.msk.f32.gmra.mrb[62].mxu0 %vm414_vm1, %v4667_v43 }
 0x2fc   : > { %3456 = vmatprep.mubr.msk.f32.mxu0 %vm414_vm1, %v4675_v28 }
 0x2ff   : > { %3457 = vmatmul.mubr.msk.f32.gmra.mrb[64].mxu0 %vm414_vm1, %v4679_v44 }
 0x300   : > { %3459 = vmatprep.mubr.msk.f32.mxu0 %vm414_vm1, %v4688_v7 }
 0x303   : > { %3460 = vmatmul.mubr.msk.f32.gmra.mrb[66].mxu0 %vm414_vm1, %v2570_v6 }
 0x366   : > { %v3340_v37 = vpop.f32.mrb[28].mxu0 }
 0x367   : > { %v1394_v19 = vadd.f32 %v3340_v37, %v1253_v53  ;;  %v1354_v35 = vpop.f32.mrb[29].mxu0  ;;  %v3354_v23 = vpop.f32.mrb[36].mxu1 }
 0x368   : > { %v1393_v0 = vadd.f32 %v1354_v35, %v1252_v34  ;;  %v1520_v27 = vpop.f32.mrb[37].mxu1 }
 0x369   : > { %1402 = vst.msk [vmem:[#allocation2 + $0x8] sm:$0xff] %vm780_vm2, %v1394_v19 }
 0x36a   : > { %1401 = vst.msk [vmem:[#allocation2] sm:$0xff] %vm780_vm2, %v1393_v0 }
 0x370   : > { %v1418_v3 = vld [vmem:[#allocation2 + $0x8] sm:$0xff] }
 0x371   : > { %v1560_v59 = vadd.f32 %v3354_v23, %v1418_v3  ;;  %v1417_v31 = vld [vmem:[#allocation2] sm:$0xff] }
 0x372   : > { %v1559_v61 = vadd.f32 %v1520_v27, %v1417_v31 }
 0x373   : > { %1568 = vst.msk [vmem:[#allocation2 + $0x8] sm:$0xff] %vm780_vm2, %v1560_v59 }
 0x374   : > { %1567 = vst.msk [vmem:[#allocation2] sm:$0xff] %vm780_vm2, %v1559_v61 }
 0x376   : > { %v3343_v36 = vpop.f32.mrb[30].mxu0 }
 0x377   : > { %v1396_v17 = vadd.f32 %v3343_v36, %v1255_v24  ;;  %v1364_v16 = vpop.f32.mrb[31].mxu0  ;;  %v3357_v38 = vpop.f32.mrb[38].mxu1 }
 0x378   : > { %v1395_v9 = vadd.f32 %v1364_v16, %v1254_v47  ;;  %v1530_v49 = vpop.f32.mrb[39].mxu1 }
 0x379   : > { %1404 = vst.msk [vmem:[#allocation2 + $0x18] sm:$0xff] %vm780_vm2, %v1396_v17 }
 0x37a   : > { %1403 = vst.msk [vmem:[#allocation2 + $0x10] sm:$0xff] %vm780_vm2, %v1395_v9  ;;  %v1584_v45 = vld [vmem:[#allocation2 + $0x8] sm:$0xff] }
 0x37b   : > { %v1583_v33 = vld [vmem:[#allocation2] sm:$0xff] }
 0x380   : > { %v1420_v13 = vld [vmem:[#allocation2 + $0x18] sm:$0xff] }
 0x381   : > { %v1562_v10 = vadd.f32 %v3357_v38, %v1420_v13  ;;  %v1419_v2 = vld [vmem:[#allocation2 + $0x10] sm:$0xff] }
 0x382   : > { %v1561_v40 = vadd.f32 %v1530_v49, %v1419_v2 }
 0x383   : > { %1570 = vst.msk [vmem:[#allocation2 + $0x18] sm:$0xff] %vm780_vm2, %v1562_v10 }
 0x384   : > { %1569 = vst.msk [vmem:[#allocation2 + $0x10] sm:$0xff] %vm780_vm2, %v1561_v40 }
 0x386   : > { %v3346_v52 = vpop.f32.mrb[32].mxu0 }
 0x387   : > { %v1398_v43 = vadd.f32 %v3346_v52, %v1257_v41  ;;  %v1374_v29 = vpop.f32.mrb[33].mxu0  ;;  %v3360_v50 = vpop.f32.mrb[40].mxu1 }
 0x388   : > { %v1397_v12 = vadd.f32 %v1374_v29, %v1256_v42  ;;  %v1540_v28 = vpop.f32.mrb[41].mxu1 }
 0x389   : > { %1406 = vst.msk [vmem:[#allocation2 + $0x28] sm:$0xff] %vm780_vm2, %v1398_v43 }
 0x38a   : > { %1405 = vst.msk [vmem:[#allocation2 + $0x20] sm:$0xff] %vm780_vm2, %v1397_v12  ;;  %v1586_v48 = vld [vmem:[#allocation2 + $0x18] sm:$0xff] }
 0x38b   : > { %v1585_v46 = vld [vmem:[#allocation2 + $0x10] sm:$0xff] }
 0x390   : > { %v1422_v44 = vld [vmem:[#allocation2 + $0x28] sm:$0xff] }
 0x391   : > { %v1564_v60 = vadd.f32 %v3360_v50, %v1422_v44  ;;  %v1421_v21 = vld [vmem:[#allocation2 + $0x20] sm:$0xff] }
 0x392   : > { %v1563_v20 = vadd.f32 %v1540_v28, %v1421_v21 }
 0x393   : > { %1572 = vst.msk [vmem:[#allocation2 + $0x28] sm:$0xff] %vm780_vm2, %v1564_v60 }
 0x394   : > { %1571 = vst.msk [vmem:[#allocation2 + $0x20] sm:$0xff] %vm780_vm2, %v1563_v20 }
 0x396   : > { %v3349_v51 = vpop.f32.mrb[34].mxu0 }
 0x397   : > { %v1400_v7 = vadd.f32 %v3349_v51, %v1259_v56  ;;  %v1384_v55 = vpop.f32.mrb[35].mxu0  ;;  %v3363_v57 = vpop.f32.mrb[42].mxu1 }
 0x398   : > { %v1399_v39 = vadd.f32 %v1384_v55, %v1258_v54  ;;  %v1550_v1 = vpop.f32.mrb[43].mxu1 }
 0x399   : > { %1408 = vst.msk [vmem:[#allocation2 + $0x38] sm:$0xff] %vm780_vm2, %v1400_v7 }
 0x39a   : > { %1407 = vst.msk [vmem:[#allocation2 + $0x30] sm:$0xff] %vm780_vm2, %v1399_v39  ;;  %v3368_v58 = vpop.f32.mrb[36].mxu0  ;;  %v1588_v53 = vld [vmem:[#allocation2 + $0x28] sm:$0xff] }
 0x39b   : > { %v1726_v62 = vadd.f32 %v3368_v58, %v1584_v45  ;;  %v1686_v32 = vpop.f32.mrb[37].mxu0  ;;  %v3382_v5 = vpop.f32.mrb[44].mxu1  ;;  %v1587_v19 = vld [vmem:[#allocation2 + $0x20] sm:$0xff] }
 0x39c   : > { %v1725_v14 = vadd.f32 %v1686_v32, %v1583_v33  ;;  %v1852_v11 = vpop.f32.mrb[45].mxu1 }
 0x39d   : > { %1734 = vst.msk [vmem:[#allocation2 + $0x8] sm:$0xff] %vm780_vm2, %v1726_v62 }
 0x39e   : > { %1733 = vst.msk [vmem:[#allocation2] sm:$0xff] %vm780_vm2, %v1725_v14  ;;  %v3371_v18 = vpop.f32.mrb[38].mxu0 }
 0x39f   : > { %v1728_v15 = vadd.f32 %v3371_v18, %v1586_v48  ;;  %v1696_v22 = vpop.f32.mrb[39].mxu0  ;;  %v3385_v4 = vpop.f32.mrb[46].mxu1 }
 0x3a0   : > { %v1424_v63 = vld [vmem:[#allocation2 + $0x38] sm:$0xff]  ;;  %v1727_v25 = vadd.f32 %v1696_v22, %v1585_v46  ;;  %v1862_v26 = vpop.f32.mrb[47].mxu1 }
 0x3a1   : > { %v1566_v8 = vadd.f32 %v3363_v57, %v1424_v63  ;;  %v1423_v30 = vld [vmem:[#allocation2 + $0x30] sm:$0xff]  ;;  %1736 = vst.msk [vmem:[#allocation2 + $0x18] sm:$0xff] %vm780_vm2, %v1728_v15 }
 0x3a2   : > { %v1565_v6 = vadd.f32 %v1550_v1, %v1423_v30  ;;  %1735 = vst.msk [vmem:[#allocation2 + $0x10] sm:$0xff] %vm780_vm2, %v1727_v25  ;;  %v3374_v34 = vpop.f32.mrb[40].mxu0 }
 0x3a3   : > { %1574 = vst.msk [vmem:[#allocation2 + $0x38] sm:$0xff] %vm780_vm2, %v1566_v8  ;;  %v1730_v37 = vadd.f32 %v3374_v34, %v1588_v53  ;;  %v1706_v35 = vpop.f32.mrb[41].mxu0  ;;  %v3388_v23 = vpop.f32.mrb[48].mxu1 }
 0x3a4   : > { %1573 = vst.msk [vmem:[#allocation2 + $0x30] sm:$0xff] %vm780_vm2, %v1565_v6  ;;  %v1750_v0 = vld [vmem:[#allocation2 + $0x8] sm:$0xff]  ;;  %v1729_v27 = vadd.f32 %v1706_v35, %v1587_v19  ;;  %v1872_v3 = vpop.f32.mrb[49].mxu1 }
 0x3a5   : > { %v1892_v59 = vadd.f32 %v3382_v5, %v1750_v0  ;;  %v1749_v31 = vld [vmem:[#allocation2] sm:$0xff]  ;;  %1738 = vst.msk [vmem:[#allocation2 + $0x28] sm:$0xff] %vm780_vm2, %v1730_v37 }
 0x3a6   : > { %v1891_v61 = vadd.f32 %v1852_v11, %v1749_v31  ;;  %1737 = vst.msk [vmem:[#allocation2 + $0x20] sm:$0xff] %vm780_vm2, %v1729_v27  ;;  %v3377_v24 = vpop.f32.mrb[42].mxu0 }
 0x3a7   : > { %1900 = vst.msk [vmem:[#allocation2 + $0x8] sm:$0xff] %vm780_vm2, %v1892_v59  ;;  %v1716_v47 = vpop.f32.mrb[43].mxu0  ;;  %v3391_v36 = vpop.f32.mrb[50].mxu1 }
 0x3a8   : > { %1899 = vst.msk [vmem:[#allocation2] sm:$0xff] %vm780_vm2, %v1891_v61  ;;  %v1752_v17 = vld [vmem:[#allocation2 + $0x18] sm:$0xff]  ;;  %v1882_v16 = vpop.f32.mrb[51].mxu1 }
 0x3a9   : > { %v1894_v38 = vadd.f32 %v3385_v4, %v1752_v17  ;;  %v1751_v9 = vld [vmem:[#allocation2 + $0x10] sm:$0xff] }
 0x3aa   : > { %v1893_v49 = vadd.f32 %v1862_v26, %v1751_v9  ;;  %v1590_v13 = vld [vmem:[#allocation2 + $0x38] sm:$0xff]  ;;  %v3396_v10 = vpop.f32.mrb[44].mxu0 }
 0x3ab   : > { %1902 = vst.msk [vmem:[#allocation2 + $0x18] sm:$0xff] %vm780_vm2, %v1894_v38  ;;  %v1732_v2 = vadd.f32 %v3377_v24, %v1590_v13  ;;  %v1589_v40 = vld [vmem:[#allocation2 + $0x30] sm:$0xff]  ;;  %v2010_v41 = vpop.f32.mrb[45].mxu0  ;;  %v3410_v42 = vpop.f32.mrb[52].mxu1 }
 0x3ac   : > { %1901 = vst.msk [vmem:[#allocation2 + $0x10] sm:$0xff] %vm780_vm2, %v1893_v49  ;;  %v1754_v52 = vld [vmem:[#allocation2 + $0x28] sm:$0xff]  ;;  %v1731_v43 = vadd.f32 %v1716_v47, %v1589_v40  ;;  %v2176_v29 = vpop.f32.mrb[53].mxu1 }
 0x3ad   : > { %v1896_v50 = vadd.f32 %v3388_v23, %v1754_v52  ;;  %v1753_v12 = vld [vmem:[#allocation2 + $0x20] sm:$0xff]  ;;  %1740 = vst.msk [vmem:[#allocation2 + $0x38] sm:$0xff] %vm780_vm2, %v1732_v2 }
 0x3ae   : > { %v1895_v28 = vadd.f32 %v1872_v3, %v1753_v12  ;;  %1739 = vst.msk [vmem:[#allocation2 + $0x30] sm:$0xff] %vm780_vm2, %v1731_v43  ;;  %v1908_v44 = vld [vmem:[#allocation2 + $0x8] sm:$0xff]  ;;  %v3399_v60 = vpop.f32.mrb[46].mxu0 }
 0x3af   : > { %1904 = vst.msk [vmem:[#allocation2 + $0x28] sm:$0xff] %vm780_vm2, %v1896_v50  ;;  %v2050_v21 = vadd.f32 %v3396_v10, %v1908_v44  ;;  %v1907_v20 = vld [vmem:[#allocation2] sm:$0xff]  ;;  %v2020_v56 = vpop.f32.mrb[47].mxu0  ;;  %v3413_v54 = vpop.f32.mrb[54].mxu1 }
 0x3b0   : > { %1903 = vst.msk [vmem:[#allocation2 + $0x20] sm:$0xff] %vm780_vm2, %v1895_v28  ;;  %v2049_v51 = vadd.f32 %v2010_v41, %v1907_v20  ;;  %v2186_v7 = vpop.f32.mrb[55].mxu1 }
 0x3b1   : > { %2058 = vst.msk [vmem:[#allocation2 + $0x8] sm:$0xff] %vm780_vm2, %v2050_v21 }
 0x3b2   : > { %2057 = vst.msk [vmem:[#allocation2] sm:$0xff] %vm780_vm2, %v2049_v51  ;;  %v1910_v55 = vld [vmem:[#allocation2 + $0x18] sm:$0xff]  ;;  %v3402_v57 = vpop.f32.mrb[48].mxu0 }
 0x3b3   : > { %v2052_v39 = vadd.f32 %v3399_v60, %v1910_v55  ;;  %v1909_v1 = vld [vmem:[#allocation2 + $0x10] sm:$0xff]  ;;  %v2030_v45 = vpop.f32.mrb[49].mxu0  ;;  %v3416_v58 = vpop.f32.mrb[56].mxu1 }
 0x3b4   : > { %v1756_v62 = vld [vmem:[#allocation2 + $0x38] sm:$0xff]  ;;  %v2051_v33 = vadd.f32 %v2020_v56, %v1909_v1  ;;  %v2196_v32 = vpop.f32.mrb[57].mxu1 }
 0x3b5   : > { %v1898_v5 = vadd.f32 %v3391_v36, %v1756_v62  ;;  %v1755_v14 = vld [vmem:[#allocation2 + $0x30] sm:$0xff]  ;;  %2060 = vst.msk [vmem:[#allocation2 + $0x18] sm:$0xff] %vm780_vm2, %v2052_v39 }
 0x3b6   : > { %v1897_v11 = vadd.f32 %v1882_v16, %v1755_v14  ;;  %2059 = vst.msk [vmem:[#allocation2 + $0x10] sm:$0xff] %vm780_vm2, %v2051_v33  ;;  %v1912_v48 = vld [vmem:[#allocation2 + $0x28] sm:$0xff]  ;;  %v3405_v18 = vpop.f32.mrb[50].mxu0 }
 0x3b7   : > { %1906 = vst.msk [vmem:[#allocation2 + $0x38] sm:$0xff] %vm780_vm2, %v1898_v5  ;;  %v2054_v15 = vadd.f32 %v3402_v57, %v1912_v48  ;;  %v1911_v46 = vld [vmem:[#allocation2 + $0x20] sm:$0xff]  ;;  %v2040_v22 = vpop.f32.mrb[51].mxu0  ;;  %v3419_v4 = vpop.f32.mrb[58].mxu1 }
 0x3b8   : > { %1905 = vst.msk [vmem:[#allocation2 + $0x30] sm:$0xff] %vm780_vm2, %v1897_v11  ;;  %v2074_v63 = vld [vmem:[#allocation2 + $0x8] sm:$0xff]  ;;  %v2053_v25 = vadd.f32 %v2030_v45, %v1911_v46  ;;  %v2206_v26 = vpop.f32.mrb[59].mxu1 }
 0x3b9   : > { %v2216_v8 = vadd.f32 %v3410_v42, %v2074_v63  ;;  %v2073_v30 = vld [vmem:[#allocation2] sm:$0xff]  ;;  %2062 = vst.msk [vmem:[#allocation2 + $0x28] sm:$0xff] %vm780_vm2, %v2054_v15 }
 0x3ba   : > { %v2215_v6 = vadd.f32 %v2176_v29, %v2073_v30  ;;  %2061 = vst.msk [vmem:[#allocation2 + $0x20] sm:$0xff] %vm780_vm2, %v2053_v25  ;;  %v3424_v53 = vpop.f32.mrb[52].mxu0 }
 0x3bb   : > { %2224 = vst.msk [vmem:[#allocation2 + $0x8] sm:$0xff] %vm780_vm2, %v2216_v8  ;;  %v2342_v34 = vpop.f32.mrb[53].mxu0  ;;  %v3438_v37 = vpop.f32.mrb[60].mxu1 }
 0x3bc   : > { %2223 = vst.msk [vmem:[#allocation2] sm:$0xff] %vm780_vm2, %v2215_v6  ;;  %v2076_v19 = vld [vmem:[#allocation2 + $0x18] sm:$0xff]  ;;  %v2508_v35 = vpop.f32.mrb[61].mxu1 }
 0x3bd   : > { %v2218_v23 = vadd.f32 %v3413_v54, %v2076_v19  ;;  %v2075_v0 = vld [vmem:[#allocation2 + $0x10] sm:$0xff] }
 0x3be   : > { %v2217_v27 = vadd.f32 %v2186_v7, %v2075_v0  ;;  %v1914_v3 = vld [vmem:[#allocation2 + $0x38] sm:$0xff]  ;;  %v3427_v59 = vpop.f32.mrb[54].mxu0 }
 0x3bf   : > { %2226 = vst.msk [vmem:[#allocation2 + $0x18] sm:$0xff] %vm780_vm2, %v2218_v23  ;;  %v2056_v31 = vadd.f32 %v3405_v18, %v1914_v3  ;;  %v1913_v61 = vld [vmem:[#allocation2 + $0x30] sm:$0xff]  ;;  %v2352_v24 = vpop.f32.mrb[55].mxu0  ;;  %v3441_v47 = vpop.f32.mrb[62].mxu1 }
 0x3c0   : > { %2225 = vst.msk [vmem:[#allocation2 + $0x10] sm:$0xff] %vm780_vm2, %v2217_v27  ;;  %v2078_v36 = vld [vmem:[#allocation2 + $0x28] sm:$0xff]  ;;  %v2055_v17 = vadd.f32 %v2040_v22, %v1913_v61  ;;  %v2518_v16 = vpop.f32.mrb[63].mxu1 }
 0x3c1   : > { %v2220_v38 = vadd.f32 %v3416_v58, %v2078_v36  ;;  %v2077_v9 = vld [vmem:[#allocation2 + $0x20] sm:$0xff]  ;;  %2064 = vst.msk [vmem:[#allocation2 + $0x38] sm:$0xff] %vm780_vm2, %v2056_v31 }
 0x3c2   : > { %v2219_v49 = vadd.f32 %v2196_v32, %v2077_v9  ;;  %2063 = vst.msk [vmem:[#allocation2 + $0x30] sm:$0xff] %vm780_vm2, %v2055_v17  ;;  %v2240_v13 = vld [vmem:[#allocation2 + $0x8] sm:$0xff]  ;;  %v3430_v10 = vpop.f32.mrb[56].mxu0 }
 0x3c3   : > { %2228 = vst.msk [vmem:[#allocation2 + $0x28] sm:$0xff] %vm780_vm2, %v2220_v38  ;;  %v2382_v2 = vadd.f32 %v3424_v53, %v2240_v13  ;;  %v2239_v40 = vld [vmem:[#allocation2] sm:$0xff]  ;;  %v2362_v41 = vpop.f32.mrb[57].mxu0  ;;  %v3444_v42 = vpop.f32.mrb[64].mxu1  ;;  %v3081_v17 = vld [vmem:[#allocation17] ss:$0 sm:$0xff] }
 0x3c4   : > { %2227 = vst.msk [vmem:[#allocation2 + $0x20] sm:$0xff] %vm780_vm2, %v2219_v49  ;;  %v2381_v52 = vadd.f32 %v2342_v34, %v2239_v40  ;;  %v2528_v43 = vpop.f32.mrb[65].mxu1 }
 0x3c5   : > { %2390 = vst.msk [vmem:[#allocation2 + $0x8] sm:$0xff] %vm780_vm2, %v2382_v2 }
 0x3c6   : > { %2389 = vst.msk [vmem:[#allocation2] sm:$0xff] %vm780_vm2, %v2381_v52  ;;  %v2242_v29 = vld [vmem:[#allocation2 + $0x18] sm:$0xff]  ;;  %v3433_v50 = vpop.f32.mrb[58].mxu0 }
 0x3c7   : > { %v2384_v12 = vadd.f32 %v3427_v59, %v2242_v29  ;;  %v2241_v28 = vld [vmem:[#allocation2 + $0x10] sm:$0xff]  ;;  %v2372_v44 = vpop.f32.mrb[59].mxu0  ;;  %v3447_v60 = vpop.f32.mrb[66].mxu1 }
 0x3c8   : > { %v2080_v21 = vld [vmem:[#allocation2 + $0x38] sm:$0xff]  ;;  %v2383_v20 = vadd.f32 %v2352_v24, %v2241_v28  ;;  %v2538_v56 = vpop.f32.mrb[67].mxu1 }
 0x3c9   : > { %v2222_v54 = vadd.f32 %v3419_v4, %v2080_v21  ;;  %v2079_v51 = vld [vmem:[#allocation2 + $0x30] sm:$0xff]  ;;  %2392 = vst.msk [vmem:[#allocation2 + $0x18] sm:$0xff] %vm780_vm2, %v2384_v12 }
 0x3ca   : > { %v2221_v7 = vadd.f32 %v2206_v26, %v2079_v51  ;;  %2391 = vst.msk [vmem:[#allocation2 + $0x10] sm:$0xff] %vm780_vm2, %v2383_v20  ;;  %v2244_v55 = vld [vmem:[#allocation2 + $0x28] sm:$0xff]  ;;  %v3452_v57 = vpop.f32.mrb[60].mxu0 }
 0x3cb   : > { %2230 = vst.msk [vmem:[#allocation2 + $0x38] sm:$0xff] %vm780_vm2, %v2222_v54  ;;  %v2386_v39 = vadd.f32 %v3430_v10, %v2244_v55  ;;  %v2243_v1 = vld [vmem:[#allocation2 + $0x20] sm:$0xff]  ;;  %v2674_v45 = vpop.f32.mrb[61].mxu0 }
 0x3cc   : > { %2229 = vst.msk [vmem:[#allocation2 + $0x30] sm:$0xff] %vm780_vm2, %v2221_v7  ;;  %v2406_v58 = vld [vmem:[#allocation2 + $0x8] sm:$0xff]  ;;  %v2385_v62 = vadd.f32 %v2362_v41, %v2243_v1 }
 0x3cd   : > { %v2548_v33 = vadd.f32 %v3438_v37, %v2406_v58  ;;  %v2405_v32 = vld [vmem:[#allocation2] sm:$0xff]  ;;  %2394 = vst.msk [vmem:[#allocation2 + $0x28] sm:$0xff] %vm780_vm2, %v2386_v39 }
 0x3ce   : > { %v2547_v5 = vadd.f32 %v2508_v35, %v2405_v32  ;;  %2393 = vst.msk [vmem:[#allocation2 + $0x20] sm:$0xff] %vm780_vm2, %v2385_v62  ;;  %v3455_v14 = vpop.f32.mrb[62].mxu0 }
 0x3cf   : > { %2556 = vst.msk [vmem:[#allocation2 + $0x8] sm:$0xff] %vm780_vm2, %v2548_v33  ;;  %v2684_v11 = vpop.f32.mrb[63].mxu0 }
 0x3d0   : > { %2555 = vst.msk [vmem:[#allocation2] sm:$0xff] %vm780_vm2, %v2547_v5  ;;  %v2408_v48 = vld [vmem:[#allocation2 + $0x18] sm:$0xff] }
 0x3d1   : > { %v2550_v18 = vadd.f32 %v3441_v47, %v2408_v48  ;;  %v2407_v15 = vld [vmem:[#allocation2 + $0x10] sm:$0xff] }
 0x3d2   : > { %v2549_v46 = vadd.f32 %v2518_v16, %v2407_v15  ;;  %v2246_v22 = vld [vmem:[#allocation2 + $0x38] sm:$0xff]  ;;  %v3458_v4 = vpop.f32.mrb[64].mxu0 }
 0x3d3   : > { %2558 = vst.msk [vmem:[#allocation2 + $0x18] sm:$0xff] %vm780_vm2, %v2550_v18  ;;  %v2388_v63 = vadd.f32 %v3433_v50, %v2246_v22  ;;  %v2245_v25 = vld [vmem:[#allocation2 + $0x30] sm:$0xff]  ;;  %v2694_v26 = vpop.f32.mrb[65].mxu0 }
 0x3d4   : > { %2557 = vst.msk [vmem:[#allocation2 + $0x10] sm:$0xff] %vm780_vm2, %v2549_v46  ;;  %v2410_v8 = vld [vmem:[#allocation2 + $0x28] sm:$0xff]  ;;  %v2387_v30 = vadd.f32 %v2372_v44, %v2245_v25 }
 0x3d5   : > { %v2552_v6 = vadd.f32 %v3444_v42, %v2410_v8  ;;  %v2409_v53 = vld [vmem:[#allocation2 + $0x20] sm:$0xff]  ;;  %2396 = vst.msk [vmem:[#allocation2 + $0x38] sm:$0xff] %vm780_vm2, %v2388_v63 }
 0x3d6   : > { %v2551_v34 = vadd.f32 %v2528_v43, %v2409_v53  ;;  %2395 = vst.msk [vmem:[#allocation2 + $0x30] sm:$0xff] %vm780_vm2, %v2387_v30  ;;  %v2572_v37 = vld [vmem:[#allocation2 + $0x8] sm:$0xff]  ;;  %v3461_v19 = vpop.f32.mrb[66].mxu0 }
 0x3d7   : > { %2560 = vst.msk [vmem:[#allocation2 + $0x28] sm:$0xff] %vm780_vm2, %v2552_v6  ;;  %v2714_v35 = vadd.f32 %v3452_v57, %v2572_v37  ;;  %v2571_v23 = vld [vmem:[#allocation2] sm:$0xff]  ;;  %v2704_v0 = vpop.f32.mrb[67].mxu0 }
 0x3d8   : > { %2559 = vst.msk [vmem:[#allocation2 + $0x20] sm:$0xff] %vm780_vm2, %v2551_v34  ;;  %v2713_v27 = vadd.f32 %v2674_v45, %v2571_v23 }
 0x3d9   : > { %2722 = vst.msk [vmem:[#allocation2 + $0x8] sm:$0xff] %vm780_vm2, %v2714_v35 }
 0x3da   : > { %2721 = vst.msk [vmem:[#allocation2] sm:$0xff] %vm780_vm2, %v2713_v27  ;;  %v2574_v3 = vld [vmem:[#allocation2 + $0x18] sm:$0xff] }
 0x3db   : > { %v2716_v59 = vadd.f32 %v3455_v14, %v2574_v3  ;;  %v2573_v31 = vld [vmem:[#allocation2 + $0x10] sm:$0xff] }
 0x3dc   : > { %v2412_v61 = vld [vmem:[#allocation2 + $0x38] sm:$0xff]  ;;  %v2715_v24 = vadd.f32 %v2684_v11, %v2573_v31 }
 0x3dd   : > { %2724 = vst.msk [vmem:[#allocation2 + $0x18] sm:$0xff] %vm780_vm2, %v2716_v59  ;;  %v2554_v47 = vadd.f32 %v3447_v60, %v2412_v61  ;;  %v2411_v36 = vld [vmem:[#allocation2 + $0x30] sm:$0xff] }
 0x3de   : > { %2723 = vst.msk [vmem:[#allocation2 + $0x10] sm:$0xff] %vm780_vm2, %v2715_v24  ;;  %v2553_v16 = vadd.f32 %v2538_v56, %v2411_v36  ;;  %v2576_v38 = vld [vmem:[#allocation2 + $0x28] sm:$0xff] }
 0x3df   : > { %2562 = vst.msk [vmem:[#allocation2 + $0x38] sm:$0xff] %vm780_vm2, %v2554_v47  ;;  %v2718_v9 = vadd.f32 %v3458_v4, %v2576_v38  ;;  %v2575_v49 = vld [vmem:[#allocation2 + $0x20] sm:$0xff] }
 0x3e0   : > { %v2730_v13 = vld [vmem:[#allocation2 + $0x8] sm:$0xff]  ;;  %2561 = vst.msk [vmem:[#allocation2 + $0x30] sm:$0xff] %vm780_vm2, %v2553_v16  ;;  %v2717_v10 = vadd.f32 %v2694_v26, %v2575_v49 }
 0x3e1   : > { %v2745_v2 = vadd.f32 %v3081_v17, %v2730_v13  ;;  %v2729_v40 = vld [vmem:[#allocation2] sm:$0xff]  ;;  %2726 = vst.msk [vmem:[#allocation2 + $0x28] sm:$0xff] %vm780_vm2, %v2718_v9 }
 0x3e2   : > { %v2744_v41 = vadd.f32 %v3081_v17, %v2729_v40  ;;  %2725 = vst.msk [vmem:[#allocation2 + $0x20] sm:$0xff] %vm780_vm2, %v2717_v10 }
 0x3e3   : > { %v2753_v42 = vmax.f32 %v2745_v2, 0.0 }
 0x3e4   : > { %v2752_v52 = vmax.f32 %v2744_v41, 0.0  ;;  %v2732_v43 = vld [vmem:[#allocation2 + $0x18] sm:$0xff] }
 0x3e5   : > { %v2747_v29 = vadd.f32 %v3081_v17, %v2732_v43  ;;  %v2731_v50 = vld [vmem:[#allocation2 + $0x10] sm:$0xff]  ;;  %2761 = vst.msk [vmem:[%s4841_s16 + $0x8] sm:$0xff] %vm780_vm2, %v2753_v42 }
 0x3e6   : > { %v2746_v12 = vadd.f32 %v3081_v17, %v2731_v50  ;;  %v2578_v28 = vld [vmem:[#allocation2 + $0x38] sm:$0xff]  ;;  %2760 = vst.msk [vmem:[%s4841_s16] sm:$0xff] %vm780_vm2, %v2752_v52 }
 0x3e7   : > { %v2755_v44 = vmax.f32 %v2747_v29, 0.0  ;;  %v2720_v60 = vadd.f32 %v3461_v19, %v2578_v28  ;;  %v2577_v21 = vld [vmem:[#allocation2 + $0x30] sm:$0xff] }
 0x3e8   : > { %v2754_v20 = vmax.f32 %v2746_v12, 0.0  ;;  %v2734_v56 = vld [vmem:[#allocation2 + $0x28] sm:$0xff]  ;;  %v2719_v54 = vadd.f32 %v2704_v0, %v2577_v21 }
 0x3e9   : > { %v2749_v51 = vadd.f32 %v3081_v17, %v2734_v56  ;;  %v2733_v7 = vld [vmem:[#allocation2 + $0x20] sm:$0xff]  ;;  %2728 = vst.msk [vmem:[#allocation2 + $0x38] sm:$0xff] %vm780_vm2, %v2720_v60  ;;  %2763 = vst.msk [vmem:[%s4841_s16 + $0x18] sm:$0xff] %vm780_vm2, %v2755_v44 }
 0x3ea   : > { %v2748_v55 = vadd.f32 %v3081_v17, %v2733_v7  ;;  %2727 = vst.msk [vmem:[#allocation2 + $0x30] sm:$0xff] %vm780_vm2, %v2719_v54  ;;  %2762 = vst.msk [vmem:[%s4841_s16 + $0x10] sm:$0xff] %vm780_vm2, %v2754_v20 }
 0x3eb   : > { %v2757_v57 = vmax.f32 %v2749_v51, 0.0 }
 0x3ec   : > { %v2756_v39 = vmax.f32 %v2748_v55, 0.0 }
 0x3ed   : > { %2765 = vst.msk [vmem:[%s4841_s16 + $0x28] sm:$0xff] %vm780_vm2, %v2757_v57 }
 0x3ee   : > { %2764 = vst.msk [vmem:[%s4841_s16 + $0x20] sm:$0xff] %vm780_vm2, %v2756_v39 }
 0x3f0   : > { %v2736_v1 = vld [vmem:[#allocation2 + $0x38] sm:$0xff] }
 0x3f1   : > { %v2751_v45 = vadd.f32 %v3081_v17, %v2736_v1  ;;  %v2735_v58 = vld [vmem:[#allocation2 + $0x30] sm:$0xff] }
 0x3f2   : > { %v2750_v62 = vadd.f32 %v3081_v17, %v2735_v58 }
 0x3f3   : > { %v2759_v33 = vmax.f32 %v2751_v45, 0.0 }
 0x3f4   : > { %v2758_v32 = vmax.f32 %v2750_v62, 0.0 }
 0x3f5   : > { %2767 = vst.msk [vmem:[%s4841_s16 + $0x38] sm:$0xff] %vm780_vm2, %v2759_v33 }
 0x3f6   : > { %2766 = vst.msk [vmem:[%s4841_s16 + $0x30] sm:$0xff] %vm780_vm2, %v2758_v32 }
 0x3f7   : > { %3789 = shalt.err (!%p3786_p8)
}
 0x3f8   : > { %s3790_s20 = scalar_lea.hbm %s4862_s28, 1024  ;;  %s3794_s8 = scalar_lea.hbm %s4919_s7, 2048 }
 0x3f9   : > { %p3791_p13 = scmp.ne.s32.totalorder %s4862_s28, %s3790_s20  ;;  %p3795_p9 = scmp.lt.u32.totalorder %s4862_s28, %s4919_s7 }
 0x3fa   : > { %p3796_p10 = scmp.lt.u32.totalorder %s3794_s8, %s3790_s20  ;;  %p3798_p6 = scmp.lt.u32.totalorder %s3790_s20, %s4862_s28 }
 0x3fb   : > { %p3792_p0 = pnand %p3791_p13, %p4941_p12 }
 0x3fc   : > { %p3797_p11 = por %p3796_p10, %p3795_p9 }
 0x3fd   : > { %p3793_p2 = pneg %p3792_p0 }
 0x3fe   : > { %p3799_p5 = por %p3798_p6, %p3797_p11 }
 0x400   : > { %p3800_p7 = pnand %p3799_p5, %p3793_p2 }
 0x402   : > { %3803 = shalt.err (!%p3800_p7)
}
 0x403   : > { %s3869_s14 = smov 128   ;;  %s3870_s19 = smov 8  }
 0x404   : > { %3490 = dma.vmem_to_hbm [thread:$0]  (%p4941_p12), %s4864_s11, 1024, %s4862_s28, %s2769_s30, %s3869_s14, %s3869_s14, %s3870_s19  }
 0x405 PF: > { %s2797_s9 = sand.u32 1, %s3842_s24   ;;  %p4942_p4 = scmp.ne.s32.totalorder %s4932_s1, 0 }
 0x406   : > { %p4943_p1 = scmp.ge.s32.totalorder %s3854_s27, 2  ;;  %s2798_s15 = scalar_lea.sflag [#allocation8], %s2797_s9 }
 0x408   : > { %p3516_p3 = pnand %p4943_p1, %p4942_p4 }
 0x40a   : > { %3837 = dma.done.wait (!%p3516_p3), %s2798_s15, 1024  }
 0x40b   : > { %3839 = vsyncadd (!%p3516_p3), %s2798_s15, 4294966272  ;;  %p23_p8 = scmp.ge.s32.totalorder %s4080_s13, 4   ;;  %s4944_s24 = smov %s3846_s25 }
 0x40c   : > { %s4945_s25 = smov %s3850_s26  ;;  %s4946_s26 = smov %s4091_s10 }
 0x40d   : > { %s4947_s27 = smov %s4080_s13  ;;  %25 = sbr.rel (!%p23_p8) target bundleno = 10 (0xa), region = 127 }
 0x414   :  { %2803 = vsyncpa [#allocation7], 1 }
 0x415   :  { %2805 = vsyncpa [#allocation7 + $0x1], 1 }
 0x416   :  { %2806 = vsyncpa [#allocation10], 1 }
 0x417   :  { %2807 = vsyncpa [#allocation13], 1 }
 0x418   :  { %2808 = vsyncpa [#allocation16], 1 }
 0x419   :  { %2809 = vsyncpa [#allocation8], 1 }
 0x41a   :  { %2811 = vsyncpa [#allocation8 + $0x1], 1 }

</bundles_post_ra>
